<compile_context>
chip_gen: v5e
topology: v5e:2x2
jax: 0.10.0
libtpu: 0.0.40
codegen_flags: <defaults>
</compile_context>

<pallas_src>
import math

import jax
import jax.numpy as jnp
from jax.experimental import pallas as pl
from jax.experimental.pallas import tpu as pltpu

# ----------------------------- model config (small, synthetic) ---------------
D_MODEL = 32
N_HEADS = 4
HEAD_DIM = D_MODEL // N_HEADS
FFN_DIM = 64
N_LAYERS = 2
VOCAB = 100
MAX_POS = 64
EPS = 1e-5
NEG_INF = -1e9

# Row layout of the packed small-parameter slab (per layer, 128-lane padded).
_SLAB_ROWS = (
    ("b_qkv", 3 * D_MODEL),
    ("bo", D_MODEL),
    ("b1", FFN_DIM),
    ("b2", D_MODEL),
    ("ln1_g", D_MODEL),
    ("ln1_b", D_MODEL),
    ("ln2_g", D_MODEL),
    ("ln2_b", D_MODEL),
)
_SLAB_ROW_IDX = {name: i for i, (name, _) in enumerate(_SLAB_ROWS)}
SLAB_WIDTH = 128


# ----------------------------- in-kernel helpers ------------------------------
def _layer_norm(x, g, b):
    mu = jnp.mean(x, axis=-1, keepdims=True)
    var = jnp.mean((x - mu) ** 2, axis=-1, keepdims=True)
    return (x - mu) * jax.lax.rsqrt(var + EPS) * g + b


# ----------------------------- Pallas kernel ---------------------------------
def fused_encoder_kernel(x_ref, mask_ref, w_qkv_ref, wo_ref, w1_ref, w2_ref,
                         slab_ref, out_ref):
    """All N_LAYERS encoder layers + whole batch, fully VMEM resident."""
    B, S = mask_ref.shape
    BS, D = x_ref.shape

    x = x_ref[...]                                             # (B*S, D) f32

    # Additive attention bias: built once, pre-broadcast, reused by every
    # head of every layer (JAX does not CSE broadcast_in_dim).
    bias = (1.0 - mask_ref[...]) * NEG_INF                     # (B, Sk)
    bias = jnp.broadcast_to(bias[:, None, :], (B, S, S))       # (B, Sq, Sk)

    for li in range(N_LAYERS):                                 # static: 2 layers
        slab = slab_ref[li]                                    # (8, 128) f32

        def vec(name):
            r = _SLAB_ROW_IDX[name]
            w = _SLAB_ROWS[r][1]
            return slab[r:r + 1, :w]                           # (1, w)

        # ---- fused QKV projection (1/sqrt(Hd) already folded into Q cols) ---
        qkv = jnp.dot(x, w_qkv_ref[li],
                      preferred_element_type=jnp.float32) + vec("b_qkv")
        q3 = qkv[:, 0:D].reshape(B, S, D)
        k3 = qkv[:, D:2 * D].reshape(B, S, D)
        v3 = qkv[:, 2 * D:3 * D].reshape(B, S, D)

        # ---- multi-head attention; per-head output projection accumulated
        #      directly into the residual stream (no lane concat). ----
        attn = None
        for h in range(N_HEADS):                               # static: 4 heads
            sl = slice(h * HEAD_DIM, (h + 1) * HEAD_DIM)
            s = jnp.einsum("bqd,bkd->bqk", q3[:, :, sl], k3[:, :, sl],
                           preferred_element_type=jnp.float32) + bias
            s = s - jnp.max(s, axis=-1, keepdims=True)
            p = jnp.exp(s)
            p = p * pl.reciprocal(jnp.sum(p, axis=-1, keepdims=True),
                                  approx=True)
            ctx = jnp.einsum("bqk,bkd->bqd", p, v3[:, :, sl],
                             preferred_element_type=jnp.float32)  # (B,S,Hd)
            proj = jnp.dot(ctx.reshape(BS, HEAD_DIM), wo_ref[li, h],
                           preferred_element_type=jnp.float32)    # (BS, D)
            attn = proj if attn is None else attn + proj
        attn = attn + vec("bo")
        h1 = _layer_norm(x + attn, vec("ln1_g"), vec("ln1_b"))

        # ---- feed-forward (SiLU / "swish", Marian default) ----
        f = jnp.dot(h1, w1_ref[li],
                    preferred_element_type=jnp.float32) + vec("b1")
        f = f * (1.0 / (1.0 + jnp.exp(-f)))
        f = jnp.dot(f, w2_ref[li],
                    preferred_element_type=jnp.float32) + vec("b2")
        x = _layer_norm(h1 + f, vec("ln2_g"), vec("ln2_b"))

    # D=32 (<128 lanes) -> masked vst; negligible here, lane-dense at real
    # Marian dims (D=512) where it would matter.
    out_ref[...] = x


# ----------------------------- wrapper ----------------------------------------
def _pack_params(params):
    """Stack per-layer weights on a leading layer axis, pack all small vectors
    into one (L, 8, 128) slab, and fold the attention scale into Q."""
    sc = 1.0 / math.sqrt(HEAD_DIM)
    w_qkv, wo, w1, w2, slabs = [], [], [], [], []
    for lp in params["layers"]:
        wq = lp["w_qkv"]
        w_qkv.append(jnp.concatenate([wq[:, :D_MODEL] * sc, wq[:, D_MODEL:]],
                                     axis=1))
        wo.append(lp["wo"].reshape(N_HEADS, HEAD_DIM, D_MODEL))
        w1.append(lp["w1"])
        w2.append(lp["w2"])

        bq = lp["b_qkv"].reshape(-1)
        bq = jnp.concatenate([bq[:D_MODEL] * sc, bq[D_MODEL:]])
        small = {"b_qkv": bq, "bo": lp["bo"], "b1": lp["b1"], "b2": lp["b2"],
                 "ln1_g": lp["ln1_g"], "ln1_b": lp["ln1_b"],
                 "ln2_g": lp["ln2_g"], "ln2_b": lp["ln2_b"]}
        rows = []
        for name, width in _SLAB_ROWS:
            v = small[name].reshape(-1).astype(jnp.float32)
            rows.append(jnp.zeros((SLAB_WIDTH,), jnp.float32).at[:width].set(v))
        slabs.append(jnp.stack(rows))
    return (jnp.stack(w_qkv).astype(jnp.float32),
            jnp.stack(wo).astype(jnp.float32),
            jnp.stack(w1).astype(jnp.float32),
            jnp.stack(w2).astype(jnp.float32),
            jnp.stack(slabs))


def marian_encoder(x, attention_mask, params):
    """x: (B, S, D) f32, attention_mask: (B, S). Returns (B, S, D)."""
    B, S, D = x.shape
    w_qkv, wo, w1, w2, slab = _pack_params(params)
    out2d = pl.pallas_call(
        fused_encoder_kernel,
        out_shape=jax.ShapeDtypeStruct((B * S, D), jnp.float32),
        # Grid-less single call: all weights + activations (~60 KB f32) are
        # VMEM resident, so every ref is the full array; nothing to pipeline.
        compiler_params=pltpu.CompilerParams(
            vmem_limit_bytes=32 * 1024 * 1024),
    )(x.reshape(B * S, D).astype(jnp.float32),
      attention_mask.astype(jnp.float32),
      w_qkv, wo, w1, w2, slab)
    return out2d.reshape(B, S, D)


# ----------------------------- parameters & glue ------------------------------
def sinusoidal_positions(max_pos, dim):
    """Marian / fairseq-style: sin in first half, cos in second half."""
    half = dim // 2
    freqs = jnp.exp(-math.log(10000.0) * jnp.arange(half) / half)
    angles = jnp.arange(max_pos)[:, None].astype(jnp.float32) * freqs[None, :]
    return jnp.concatenate([jnp.sin(angles), jnp.cos(angles)], axis=-1)


def init_params(key):
    keys = jax.random.split(key, 1 + N_LAYERS)
    params = {
        "embed_tokens": jax.random.normal(keys[0], (VOCAB, D_MODEL),
                                          jnp.float32) * 0.02,
        "embed_positions": sinusoidal_positions(MAX_POS, D_MODEL),
        "layers": [],
    }
    s = 0.02
    for li in range(N_LAYERS):
        lk = jax.random.split(keys[1 + li], 4)
        layer = {
            # Wq | Wk | Wv fused along the output dim -> one (D, 3D) matmul.
            "w_qkv": jax.random.normal(lk[0], (D_MODEL, 3 * D_MODEL),
                                       jnp.float32) * s,
            "b_qkv": jnp.zeros((1, 3 * D_MODEL), jnp.float32),
            "wo": jax.random.normal(lk[1], (D_MODEL, D_MODEL), jnp.float32) * s,
            "bo": jnp.zeros((1, D_MODEL), jnp.float32),
            "ln1_g": jnp.ones((1, D_MODEL), jnp.float32),
            "ln1_b": jnp.zeros((1, D_MODEL), jnp.float32),
            "w1": jax.random.normal(lk[2], (D_MODEL, FFN_DIM), jnp.float32) * s,
            "b1": jnp.zeros((1, FFN_DIM), jnp.float32),
            "w2": jax.random.normal(lk[3], (FFN_DIM, D_MODEL), jnp.float32) * s,
            "b2": jnp.zeros((1, D_MODEL), jnp.float32),
            "ln2_g": jnp.ones((1, D_MODEL), jnp.float32),
            "ln2_b": jnp.zeros((1, D_MODEL), jnp.float32),
        }
        params["layers"].append(layer)
    return params


@jax.jit
def forward(params, input_ids, attention_mask):
    """Marian-style encoder forward -> last_hidden_state (B, S, D)."""
    B, S = input_ids.shape
    embed_scale = math.sqrt(D_MODEL)  # Marian: scale_embedding=True
    x = params["embed_tokens"][input_ids] * embed_scale
    x = x + params["embed_positions"][:S][None, :, :]
    return marian_encoder(x.astype(jnp.float32), attention_mask, params)


# ----------------------------- demo -------------------------------------------
if __name__ == "__main__":
    key = jax.random.PRNGKey(0)
    k_ids, k_params = jax.random.split(key)

    B, S = 2, 8
    input_ids = jax.random.randint(k_ids, (B, S), 0, VOCAB, dtype=jnp.int32)
    attention_mask = jnp.ones((B, S), dtype=jnp.int32)

    params = init_params(k_params)
    out = forward(params, input_ids, attention_mask)
    out = jax.block_until_ready(out)

    assert out.shape == (B, S, D_MODEL), out.shape
    assert bool(jnp.all(jnp.isfinite(out)))
    print("KERNEL_OK")
</pallas_src>

<mosaic_0001>
module attributes {stable_mosaic.version = 11 : i64} {
  func.func @fused_encoder_kernel(%arg0: memref<16x32xf32, #tpu.memory_space<vmem>>, %arg1: memref<2x8xf32, #tpu.memory_space<vmem>>, %arg2: memref<2x32x96xf32, #tpu.memory_space<vmem>>, %arg3: memref<2x4x8x32xf32, #tpu.memory_space<vmem>>, %arg4: memref<2x32x64xf32, #tpu.memory_space<vmem>>, %arg5: memref<2x64x32xf32, #tpu.memory_space<vmem>>, %arg6: memref<2x8x128xf32, #tpu.memory_space<vmem>>, %arg7: memref<16x32xf32, #tpu.memory_space<vmem>>) attributes {dimension_semantics = [], scalar_prefetch = 0 : i64, scratch_operands = 0 : i64, tpu.core_type = #tpu.core_type<tc>} {
    %c0 = arith.constant 0 : index
    %c0_0 = arith.constant 0 : index
    %0 = vector.load %arg0[%c0, %c0_0] : memref<16x32xf32, #tpu.memory_space<vmem>>, vector<16x32xf32>
    %c0_1 = arith.constant 0 : index
    %c0_2 = arith.constant 0 : index
    %1 = vector.load %arg1[%c0_1, %c0_2] : memref<2x8xf32, #tpu.memory_space<vmem>>, vector<2x8xf32>
    %cst = arith.constant 1.000000e+00 : f32
    %2 = vector.broadcast %cst : f32 to vector<2x8xf32>
    %3 = arith.subf %2, %1 : vector<2x8xf32>
    %cst_3 = arith.constant -1.000000e+09 : f32
    %4 = vector.broadcast %cst_3 : f32 to vector<2x8xf32>
    %5 = arith.mulf %3, %4 : vector<2x8xf32>
    %6 = vector.shape_cast %5 : vector<2x8xf32> to vector<2x1x8xf32>
    %7 = vector.shape_cast %6 : vector<2x1x8xf32> to vector<2x1x8xf32>
    %8 = vector.broadcast %7 : vector<2x1x8xf32> to vector<2x8x8xf32>
    %c0_4 = arith.constant 0 : index
    %c0_5 = arith.constant 0 : index
    %c0_6 = arith.constant 0 : index
    %9 = vector.load %arg6[%c0_4, %c0_5, %c0_6] : memref<2x8x128xf32, #tpu.memory_space<vmem>>, vector<1x8x128xf32>
    %10 = vector.shape_cast %9 : vector<1x8x128xf32> to vector<8x128xf32>
    %c0_7 = arith.constant 0 : index
    %c0_8 = arith.constant 0 : index
    %c0_9 = arith.constant 0 : index
    %11 = vector.load %arg2[%c0_7, %c0_8, %c0_9] : memref<2x32x96xf32, #tpu.memory_space<vmem>>, vector<1x32x96xf32>
    %12 = vector.shape_cast %11 : vector<1x32x96xf32> to vector<32x96xf32>
    %cst_10 = arith.constant dense<0.000000e+00> : vector<16x96xf32>
    %13 = tpu.matmul %0, %12, %cst_10 {dimension_numbers = #tpu.dot_dimension_numbers<[1], [0], [0], [1], [0, 0, 1, 1], [], []>} : vector<16x32xf32>, vector<32x96xf32>, vector<16x96xf32> -> vector<16x96xf32>
    %14 = vector.extract_strided_slice %10 {offsets = [0, 0], sizes = [1, 96], strides = [1, 1]} : vector<8x128xf32> to vector<1x96xf32>
    %15 = vector.broadcast %14 : vector<1x96xf32> to vector<16x96xf32>
    %16 = arith.addf %13, %15 : vector<16x96xf32>
    %17 = vector.extract_strided_slice %16 {offsets = [0, 0], sizes = [16, 32], strides = [1, 1]} : vector<16x96xf32> to vector<16x32xf32>
    %18 = vector.shape_cast %17 : vector<16x32xf32> to vector<2x8x32xf32>
    %19 = vector.extract_strided_slice %16 {offsets = [0, 32], sizes = [16, 32], strides = [1, 1]} : vector<16x96xf32> to vector<16x32xf32>
    %20 = vector.shape_cast %19 : vector<16x32xf32> to vector<2x8x32xf32>
    %21 = vector.extract_strided_slice %16 {offsets = [0, 64], sizes = [16, 32], strides = [1, 1]} : vector<16x96xf32> to vector<16x32xf32>
    %22 = vector.shape_cast %21 : vector<16x32xf32> to vector<2x8x32xf32>
    %23 = vector.extract_strided_slice %18 {offsets = [0, 0, 0], sizes = [2, 8, 8], strides = [1, 1, 1]} : vector<2x8x32xf32> to vector<2x8x8xf32>
    %24 = vector.extract_strided_slice %20 {offsets = [0, 0, 0], sizes = [2, 8, 8], strides = [1, 1, 1]} : vector<2x8x32xf32> to vector<2x8x8xf32>
    "tpu.trace_start"() <{level = 10 : i32, message = "bqd,bkd->bqk"}> : () -> ()
    %cst_11 = arith.constant dense<0.000000e+00> : vector<2x8x8xf32>
    %25 = tpu.matmul %23, %24, %cst_11 {dimension_numbers = #tpu.dot_dimension_numbers<[2], [2], [1], [1], [0, 0, 0, 1, 1, 1], [0], [0]>} : vector<2x8x8xf32>, vector<2x8x8xf32>, vector<2x8x8xf32> -> vector<2x8x8xf32>
    "tpu.trace_stop"() : () -> ()
    %26 = arith.addf %25, %8 : vector<2x8x8xf32>
    %cst_12 = arith.constant dense<0xFF800000> : vector<2x8xf32>
    %27 = vector.multi_reduction <maximumf>, %26, %cst_12 [2] : vector<2x8x8xf32> to vector<2x8xf32>
    %28 = vector.shape_cast %27 : vector<2x8xf32> to vector<2x8x1xf32>
    %29 = vector.broadcast %28 : vector<2x8x1xf32> to vector<2x8x8xf32>
    %30 = arith.subf %26, %29 : vector<2x8x8xf32>
    %31 = math.exp %30 : vector<2x8x8xf32>
    %cst_13 = arith.constant dense<0.000000e+00> : vector<2x8xf32>
    %32 = vector.multi_reduction <add>, %31, %cst_13 [2] : vector<2x8x8xf32> to vector<2x8xf32>
    %33 = vector.shape_cast %32 : vector<2x8xf32> to vector<2x8x1xf32>
    %34 = tpu.reciprocal %33 {approx = true} : vector<2x8x1xf32> -> vector<2x8x1xf32>
    %35 = vector.broadcast %34 : vector<2x8x1xf32> to vector<2x8x8xf32>
    %36 = arith.mulf %31, %35 : vector<2x8x8xf32>
    %37 = vector.extract_strided_slice %22 {offsets = [0, 0, 0], sizes = [2, 8, 8], strides = [1, 1, 1]} : vector<2x8x32xf32> to vector<2x8x8xf32>
    "tpu.trace_start"() <{level = 10 : i32, message = "bqk,bkd->bqd"}> : () -> ()
    %cst_14 = arith.constant dense<0.000000e+00> : vector<2x8x8xf32>
    %38 = tpu.matmul %36, %37, %cst_14 {dimension_numbers = #tpu.dot_dimension_numbers<[2], [1], [1], [2], [0, 0, 0, 1, 1, 2], [0], [0]>} : vector<2x8x8xf32>, vector<2x8x8xf32>, vector<2x8x8xf32> -> vector<2x8x8xf32>
    "tpu.trace_stop"() : () -> ()
    %39 = vector.shape_cast %38 : vector<2x8x8xf32> to vector<16x8xf32>
    %c0_15 = arith.constant 0 : index
    %c0_16 = arith.constant 0 : index
    %c0_17 = arith.constant 0 : index
    %c0_18 = arith.constant 0 : index
    %40 = vector.load %arg3[%c0_15, %c0_16, %c0_17, %c0_18] : memref<2x4x8x32xf32, #tpu.memory_space<vmem>>, vector<1x1x8x32xf32>
    %41 = vector.shape_cast %40 : vector<1x1x8x32xf32> to vector<8x32xf32>
    %cst_19 = arith.constant dense<0.000000e+00> : vector<16x32xf32>
    %42 = tpu.matmul %39, %41, %cst_19 {dimension_numbers = #tpu.dot_dimension_numbers<[1], [0], [0], [1], [0, 0, 1, 1], [], []>} : vector<16x8xf32>, vector<8x32xf32>, vector<16x32xf32> -> vector<16x32xf32>
    %43 = vector.extract_strided_slice %18 {offsets = [0, 0, 8], sizes = [2, 8, 8], strides = [1, 1, 1]} : vector<2x8x32xf32> to vector<2x8x8xf32>
    %44 = vector.extract_strided_slice %20 {offsets = [0, 0, 8], sizes = [2, 8, 8], strides = [1, 1, 1]} : vector<2x8x32xf32> to vector<2x8x8xf32>
    "tpu.trace_start"() <{level = 10 : i32, message = "bqd,bkd->bqk"}> : () -> ()
    %cst_20 = arith.constant dense<0.000000e+00> : vector<2x8x8xf32>
    %45 = tpu.matmul %43, %44, %cst_20 {dimension_numbers = #tpu.dot_dimension_numbers<[2], [2], [1], [1], [0, 0, 0, 1, 1, 1], [0], [0]>} : vector<2x8x8xf32>, vector<2x8x8xf32>, vector<2x8x8xf32> -> vector<2x8x8xf32>
    "tpu.trace_stop"() : () -> ()
    %46 = arith.addf %45, %8 : vector<2x8x8xf32>
    %cst_21 = arith.constant dense<0xFF800000> : vector<2x8xf32>
    %47 = vector.multi_reduction <maximumf>, %46, %cst_21 [2] : vector<2x8x8xf32> to vector<2x8xf32>
    %48 = vector.shape_cast %47 : vector<2x8xf32> to vector<2x8x1xf32>
    %49 = vector.broadcast %48 : vector<2x8x1xf32> to vector<2x8x8xf32>
    %50 = arith.subf %46, %49 : vector<2x8x8xf32>
    %51 = math.exp %50 : vector<2x8x8xf32>
    %cst_22 = arith.constant dense<0.000000e+00> : vector<2x8xf32>
    %52 = vector.multi_reduction <add>, %51, %cst_22 [2] : vector<2x8x8xf32> to vector<2x8xf32>
    %53 = vector.shape_cast %52 : vector<2x8xf32> to vector<2x8x1xf32>
    %54 = tpu.reciprocal %53 {approx = true} : vector<2x8x1xf32> -> vector<2x8x1xf32>
    %55 = vector.broadcast %54 : vector<2x8x1xf32> to vector<2x8x8xf32>
    %56 = arith.mulf %51, %55 : vector<2x8x8xf32>
    %57 = vector.extract_strided_slice %22 {offsets = [0, 0, 8], sizes = [2, 8, 8], strides = [1, 1, 1]} : vector<2x8x32xf32> to vector<2x8x8xf32>
    "tpu.trace_start"() <{level = 10 : i32, message = "bqk,bkd->bqd"}> : () -> ()
    %cst_23 = arith.constant dense<0.000000e+00> : vector<2x8x8xf32>
    %58 = tpu.matmul %56, %57, %cst_23 {dimension_numbers = #tpu.dot_dimension_numbers<[2], [1], [1], [2], [0, 0, 0, 1, 1, 2], [0], [0]>} : vector<2x8x8xf32>, vector<2x8x8xf32>, vector<2x8x8xf32> -> vector<2x8x8xf32>
    "tpu.trace_stop"() : () -> ()
    %59 = vector.shape_cast %58 : vector<2x8x8xf32> to vector<16x8xf32>
    %c0_24 = arith.constant 0 : index
    %c1 = arith.constant 1 : index
    %c0_25 = arith.constant 0 : index
    %c0_26 = arith.constant 0 : index
    %60 = vector.load %arg3[%c0_24, %c1, %c0_25, %c0_26] : memref<2x4x8x32xf32, #tpu.memory_space<vmem>>, vector<1x1x8x32xf32>
    %61 = vector.shape_cast %60 : vector<1x1x8x32xf32> to vector<8x32xf32>
    %cst_27 = arith.constant dense<0.000000e+00> : vector<16x32xf32>
    %62 = tpu.matmul %59, %61, %cst_27 {dimension_numbers = #tpu.dot_dimension_numbers<[1], [0], [0], [1], [0, 0, 1, 1], [], []>} : vector<16x8xf32>, vector<8x32xf32>, vector<16x32xf32> -> vector<16x32xf32>
    %63 = arith.addf %42, %62 : vector<16x32xf32>
    %64 = vector.extract_strided_slice %18 {offsets = [0, 0, 16], sizes = [2, 8, 8], strides = [1, 1, 1]} : vector<2x8x32xf32> to vector<2x8x8xf32>
    %65 = vector.extract_strided_slice %20 {offsets = [0, 0, 16], sizes = [2, 8, 8], strides = [1, 1, 1]} : vector<2x8x32xf32> to vector<2x8x8xf32>
    "tpu.trace_start"() <{level = 10 : i32, message = "bqd,bkd->bqk"}> : () -> ()
    %cst_28 = arith.constant dense<0.000000e+00> : vector<2x8x8xf32>
    %66 = tpu.matmul %64, %65, %cst_28 {dimension_numbers = #tpu.dot_dimension_numbers<[2], [2], [1], [1], [0, 0, 0, 1, 1, 1], [0], [0]>} : vector<2x8x8xf32>, vector<2x8x8xf32>, vector<2x8x8xf32> -> vector<2x8x8xf32>
    "tpu.trace_stop"() : () -> ()
    %67 = arith.addf %66, %8 : vector<2x8x8xf32>
    %cst_29 = arith.constant dense<0xFF800000> : vector<2x8xf32>
    %68 = vector.multi_reduction <maximumf>, %67, %cst_29 [2] : vector<2x8x8xf32> to vector<2x8xf32>
    %69 = vector.shape_cast %68 : vector<2x8xf32> to vector<2x8x1xf32>
    %70 = vector.broadcast %69 : vector<2x8x1xf32> to vector<2x8x8xf32>
    %71 = arith.subf %67, %70 : vector<2x8x8xf32>
    %72 = math.exp %71 : vector<2x8x8xf32>
    %cst_30 = arith.constant dense<0.000000e+00> : vector<2x8xf32>
    %73 = vector.multi_reduction <add>, %72, %cst_30 [2] : vector<2x8x8xf32> to vector<2x8xf32>
    %74 = vector.shape_cast %73 : vector<2x8xf32> to vector<2x8x1xf32>
    %75 = tpu.reciprocal %74 {approx = true} : vector<2x8x1xf32> -> vector<2x8x1xf32>
    %76 = vector.broadcast %75 : vector<2x8x1xf32> to vector<2x8x8xf32>
    %77 = arith.mulf %72, %76 : vector<2x8x8xf32>
    %78 = vector.extract_strided_slice %22 {offsets = [0, 0, 16], sizes = [2, 8, 8], strides = [1, 1, 1]} : vector<2x8x32xf32> to vector<2x8x8xf32>
    "tpu.trace_start"() <{level = 10 : i32, message = "bqk,bkd->bqd"}> : () -> ()
    %cst_31 = arith.constant dense<0.000000e+00> : vector<2x8x8xf32>
    %79 = tpu.matmul %77, %78, %cst_31 {dimension_numbers = #tpu.dot_dimension_numbers<[2], [1], [1], [2], [0, 0, 0, 1, 1, 2], [0], [0]>} : vector<2x8x8xf32>, vector<2x8x8xf32>, vector<2x8x8xf32> -> vector<2x8x8xf32>
    "tpu.trace_stop"() : () -> ()
    %80 = vector.shape_cast %79 : vector<2x8x8xf32> to vector<16x8xf32>
    %c0_32 = arith.constant 0 : index
    %c2 = arith.constant 2 : index
    %c0_33 = arith.constant 0 : index
    %c0_34 = arith.constant 0 : index
    %81 = vector.load %arg3[%c0_32, %c2, %c0_33, %c0_34] : memref<2x4x8x32xf32, #tpu.memory_space<vmem>>, vector<1x1x8x32xf32>
    %82 = vector.shape_cast %81 : vector<1x1x8x32xf32> to vector<8x32xf32>
    %cst_35 = arith.constant dense<0.000000e+00> : vector<16x32xf32>
    %83 = tpu.matmul %80, %82, %cst_35 {dimension_numbers = #tpu.dot_dimension_numbers<[1], [0], [0], [1], [0, 0, 1, 1], [], []>} : vector<16x8xf32>, vector<8x32xf32>, vector<16x32xf32> -> vector<16x32xf32>
    %84 = arith.addf %63, %83 : vector<16x32xf32>
    %85 = vector.extract_strided_slice %18 {offsets = [0, 0, 24], sizes = [2, 8, 8], strides = [1, 1, 1]} : vector<2x8x32xf32> to vector<2x8x8xf32>
    %86 = vector.extract_strided_slice %20 {offsets = [0, 0, 24], sizes = [2, 8, 8], strides = [1, 1, 1]} : vector<2x8x32xf32> to vector<2x8x8xf32>
    "tpu.trace_start"() <{level = 10 : i32, message = "bqd,bkd->bqk"}> : () -> ()
    %cst_36 = arith.constant dense<0.000000e+00> : vector<2x8x8xf32>
    %87 = tpu.matmul %85, %86, %cst_36 {dimension_numbers = #tpu.dot_dimension_numbers<[2], [2], [1], [1], [0, 0, 0, 1, 1, 1], [0], [0]>} : vector<2x8x8xf32>, vector<2x8x8xf32>, vector<2x8x8xf32> -> vector<2x8x8xf32>
    "tpu.trace_stop"() : () -> ()
    %88 = arith.addf %87, %8 : vector<2x8x8xf32>
    %cst_37 = arith.constant dense<0xFF800000> : vector<2x8xf32>
    %89 = vector.multi_reduction <maximumf>, %88, %cst_37 [2] : vector<2x8x8xf32> to vector<2x8xf32>
    %90 = vector.shape_cast %89 : vector<2x8xf32> to vector<2x8x1xf32>
    %91 = vector.broadcast %90 : vector<2x8x1xf32> to vector<2x8x8xf32>
    %92 = arith.subf %88, %91 : vector<2x8x8xf32>
    %93 = math.exp %92 : vector<2x8x8xf32>
    %cst_38 = arith.constant dense<0.000000e+00> : vector<2x8xf32>
    %94 = vector.multi_reduction <add>, %93, %cst_38 [2] : vector<2x8x8xf32> to vector<2x8xf32>
    %95 = vector.shape_cast %94 : vector<2x8xf32> to vector<2x8x1xf32>
    %96 = tpu.reciprocal %95 {approx = true} : vector<2x8x1xf32> -> vector<2x8x1xf32>
    %97 = vector.broadcast %96 : vector<2x8x1xf32> to vector<2x8x8xf32>
    %98 = arith.mulf %93, %97 : vector<2x8x8xf32>
    %99 = vector.extract_strided_slice %22 {offsets = [0, 0, 24], sizes = [2, 8, 8], strides = [1, 1, 1]} : vector<2x8x32xf32> to vector<2x8x8xf32>
    "tpu.trace_start"() <{level = 10 : i32, message = "bqk,bkd->bqd"}> : () -> ()
    %cst_39 = arith.constant dense<0.000000e+00> : vector<2x8x8xf32>
    %100 = tpu.matmul %98, %99, %cst_39 {dimension_numbers = #tpu.dot_dimension_numbers<[2], [1], [1], [2], [0, 0, 0, 1, 1, 2], [0], [0]>} : vector<2x8x8xf32>, vector<2x8x8xf32>, vector<2x8x8xf32> -> vector<2x8x8xf32>
    "tpu.trace_stop"() : () -> ()
    %101 = vector.shape_cast %100 : vector<2x8x8xf32> to vector<16x8xf32>
    %c0_40 = arith.constant 0 : index
    %c3 = arith.constant 3 : index
    %c0_41 = arith.constant 0 : index
    %c0_42 = arith.constant 0 : index
    %102 = vector.load %arg3[%c0_40, %c3, %c0_41, %c0_42] : memref<2x4x8x32xf32, #tpu.memory_space<vmem>>, vector<1x1x8x32xf32>
    %103 = vector.shape_cast %102 : vector<1x1x8x32xf32> to vector<8x32xf32>
    %cst_43 = arith.constant dense<0.000000e+00> : vector<16x32xf32>
    %104 = tpu.matmul %101, %103, %cst_43 {dimension_numbers = #tpu.dot_dimension_numbers<[1], [0], [0], [1], [0, 0, 1, 1], [], []>} : vector<16x8xf32>, vector<8x32xf32>, vector<16x32xf32> -> vector<16x32xf32>
    %105 = arith.addf %84, %104 : vector<16x32xf32>
    %106 = vector.extract_strided_slice %10 {offsets = [1, 0], sizes = [1, 32], strides = [1, 1]} : vector<8x128xf32> to vector<1x32xf32>
    %107 = vector.broadcast %106 : vector<1x32xf32> to vector<16x32xf32>
    %108 = arith.addf %105, %107 : vector<16x32xf32>
    %109 = arith.addf %0, %108 : vector<16x32xf32>
    %110 = vector.extract_strided_slice %10 {offsets = [4, 0], sizes = [1, 32], strides = [1, 1]} : vector<8x128xf32> to vector<1x32xf32>
    %111 = vector.extract_strided_slice %10 {offsets = [5, 0], sizes = [1, 32], strides = [1, 1]} : vector<8x128xf32> to vector<1x32xf32>
    %cst_44 = arith.constant dense<0.000000e+00> : vector<16xf32>
    %112 = vector.multi_reduction <add>, %109, %cst_44 [1] : vector<16x32xf32> to vector<16xf32>
    %113 = vector.shape_cast %112 : vector<16xf32> to vector<16x1xf32>
    %cst_45 = arith.constant 3.200000e+01 : f32
    %114 = vector.broadcast %cst_45 : f32 to vector<16x1xf32>
    %115 = arith.divf %113, %114 : vector<16x1xf32>
    %116 = vector.broadcast %115 : vector<16x1xf32> to vector<16x32xf32>
    %117 = arith.subf %109, %116 : vector<16x32xf32>
    %118 = arith.mulf %117, %117 : vector<16x32xf32>
    %cst_46 = arith.constant dense<0.000000e+00> : vector<16xf32>
    %119 = vector.multi_reduction <add>, %118, %cst_46 [1] : vector<16x32xf32> to vector<16xf32>
    %120 = vector.shape_cast %119 : vector<16xf32> to vector<16x1xf32>
    %cst_47 = arith.constant 3.200000e+01 : f32
    %121 = vector.broadcast %cst_47 : f32 to vector<16x1xf32>
    %122 = arith.divf %120, %121 : vector<16x1xf32>
    %123 = vector.broadcast %115 : vector<16x1xf32> to vector<16x32xf32>
    %124 = arith.subf %109, %123 : vector<16x32xf32>
    %cst_48 = arith.constant 9.99999974E-6 : f32
    %125 = vector.broadcast %cst_48 : f32 to vector<16x1xf32>
    %126 = arith.addf %122, %125 : vector<16x1xf32>
    %127 = math.rsqrt %126 : vector<16x1xf32>
    %128 = vector.broadcast %127 : vector<16x1xf32> to vector<16x32xf32>
    %129 = arith.mulf %124, %128 : vector<16x32xf32>
    %130 = vector.broadcast %110 : vector<1x32xf32> to vector<16x32xf32>
    %131 = arith.mulf %129, %130 : vector<16x32xf32>
    %132 = vector.broadcast %111 : vector<1x32xf32> to vector<16x32xf32>
    %133 = arith.addf %131, %132 : vector<16x32xf32>
    %c0_49 = arith.constant 0 : index
    %c0_50 = arith.constant 0 : index
    %c0_51 = arith.constant 0 : index
    %134 = vector.load %arg4[%c0_49, %c0_50, %c0_51] : memref<2x32x64xf32, #tpu.memory_space<vmem>>, vector<1x32x64xf32>
    %135 = vector.shape_cast %134 : vector<1x32x64xf32> to vector<32x64xf32>
    %cst_52 = arith.constant dense<0.000000e+00> : vector<16x64xf32>
    %136 = tpu.matmul %133, %135, %cst_52 {dimension_numbers = #tpu.dot_dimension_numbers<[1], [0], [0], [1], [0, 0, 1, 1], [], []>} : vector<16x32xf32>, vector<32x64xf32>, vector<16x64xf32> -> vector<16x64xf32>
    %137 = vector.extract_strided_slice %10 {offsets = [2, 0], sizes = [1, 64], strides = [1, 1]} : vector<8x128xf32> to vector<1x64xf32>
    %138 = vector.broadcast %137 : vector<1x64xf32> to vector<16x64xf32>
    %139 = arith.addf %136, %138 : vector<16x64xf32>
    %cst_53 = arith.constant 0.000000e+00 : f32
    %140 = vector.broadcast %cst_53 : f32 to vector<16x64xf32>
    %141 = arith.subf %140, %139 : vector<16x64xf32>
    %142 = math.exp %141 : vector<16x64xf32>
    %cst_54 = arith.constant 1.000000e+00 : f32
    %143 = vector.broadcast %cst_54 : f32 to vector<16x64xf32>
    %144 = arith.addf %143, %142 : vector<16x64xf32>
    %cst_55 = arith.constant 1.000000e+00 : f32
    %145 = vector.broadcast %cst_55 : f32 to vector<16x64xf32>
    %146 = arith.divf %145, %144 : vector<16x64xf32>
    %147 = arith.mulf %139, %146 : vector<16x64xf32>
    %c0_56 = arith.constant 0 : index
    %c0_57 = arith.constant 0 : index
    %c0_58 = arith.constant 0 : index
    %148 = vector.load %arg5[%c0_56, %c0_57, %c0_58] : memref<2x64x32xf32, #tpu.memory_space<vmem>>, vector<1x64x32xf32>
    %149 = vector.shape_cast %148 : vector<1x64x32xf32> to vector<64x32xf32>
    %cst_59 = arith.constant dense<0.000000e+00> : vector<16x32xf32>
    %150 = tpu.matmul %147, %149, %cst_59 {dimension_numbers = #tpu.dot_dimension_numbers<[1], [0], [0], [1], [0, 0, 1, 1], [], []>} : vector<16x64xf32>, vector<64x32xf32>, vector<16x32xf32> -> vector<16x32xf32>
    %151 = vector.extract_strided_slice %10 {offsets = [3, 0], sizes = [1, 32], strides = [1, 1]} : vector<8x128xf32> to vector<1x32xf32>
    %152 = vector.broadcast %151 : vector<1x32xf32> to vector<16x32xf32>
    %153 = arith.addf %150, %152 : vector<16x32xf32>
    %154 = arith.addf %133, %153 : vector<16x32xf32>
    %155 = vector.extract_strided_slice %10 {offsets = [6, 0], sizes = [1, 32], strides = [1, 1]} : vector<8x128xf32> to vector<1x32xf32>
    %156 = vector.extract_strided_slice %10 {offsets = [7, 0], sizes = [1, 32], strides = [1, 1]} : vector<8x128xf32> to vector<1x32xf32>
    %cst_60 = arith.constant dense<0.000000e+00> : vector<16xf32>
    %157 = vector.multi_reduction <add>, %154, %cst_60 [1] : vector<16x32xf32> to vector<16xf32>
    %158 = vector.shape_cast %157 : vector<16xf32> to vector<16x1xf32>
    %cst_61 = arith.constant 3.200000e+01 : f32
    %159 = vector.broadcast %cst_61 : f32 to vector<16x1xf32>
    %160 = arith.divf %158, %159 : vector<16x1xf32>
    %161 = vector.broadcast %160 : vector<16x1xf32> to vector<16x32xf32>
    %162 = arith.subf %154, %161 : vector<16x32xf32>
    %163 = arith.mulf %162, %162 : vector<16x32xf32>
    %cst_62 = arith.constant dense<0.000000e+00> : vector<16xf32>
    %164 = vector.multi_reduction <add>, %163, %cst_62 [1] : vector<16x32xf32> to vector<16xf32>
    %165 = vector.shape_cast %164 : vector<16xf32> to vector<16x1xf32>
    %cst_63 = arith.constant 3.200000e+01 : f32
    %166 = vector.broadcast %cst_63 : f32 to vector<16x1xf32>
    %167 = arith.divf %165, %166 : vector<16x1xf32>
    %168 = vector.broadcast %160 : vector<16x1xf32> to vector<16x32xf32>
    %169 = arith.subf %154, %168 : vector<16x32xf32>
    %cst_64 = arith.constant 9.99999974E-6 : f32
    %170 = vector.broadcast %cst_64 : f32 to vector<16x1xf32>
    %171 = arith.addf %167, %170 : vector<16x1xf32>
    %172 = math.rsqrt %171 : vector<16x1xf32>
    %173 = vector.broadcast %172 : vector<16x1xf32> to vector<16x32xf32>
    %174 = arith.mulf %169, %173 : vector<16x32xf32>
    %175 = vector.broadcast %155 : vector<1x32xf32> to vector<16x32xf32>
    %176 = arith.mulf %174, %175 : vector<16x32xf32>
    %177 = vector.broadcast %156 : vector<1x32xf32> to vector<16x32xf32>
    %178 = arith.addf %176, %177 : vector<16x32xf32>
    %c1_65 = arith.constant 1 : index
    %c0_66 = arith.constant 0 : index
    %c0_67 = arith.constant 0 : index
    %179 = vector.load %arg6[%c1_65, %c0_66, %c0_67] : memref<2x8x128xf32, #tpu.memory_space<vmem>>, vector<1x8x128xf32>
    %180 = vector.shape_cast %179 : vector<1x8x128xf32> to vector<8x128xf32>
    %c1_68 = arith.constant 1 : index
    %c0_69 = arith.constant 0 : index
    %c0_70 = arith.constant 0 : index
    %181 = vector.load %arg2[%c1_68, %c0_69, %c0_70] : memref<2x32x96xf32, #tpu.memory_space<vmem>>, vector<1x32x96xf32>
    %182 = vector.shape_cast %181 : vector<1x32x96xf32> to vector<32x96xf32>
    %cst_71 = arith.constant dense<0.000000e+00> : vector<16x96xf32>
    %183 = tpu.matmul %178, %182, %cst_71 {dimension_numbers = #tpu.dot_dimension_numbers<[1], [0], [0], [1], [0, 0, 1, 1], [], []>} : vector<16x32xf32>, vector<32x96xf32>, vector<16x96xf32> -> vector<16x96xf32>
    %184 = vector.extract_strided_slice %180 {offsets = [0, 0], sizes = [1, 96], strides = [1, 1]} : vector<8x128xf32> to vector<1x96xf32>
    %185 = vector.broadcast %184 : vector<1x96xf32> to vector<16x96xf32>
    %186 = arith.addf %183, %185 : vector<16x96xf32>
    %187 = vector.extract_strided_slice %186 {offsets = [0, 0], sizes = [16, 32], strides = [1, 1]} : vector<16x96xf32> to vector<16x32xf32>
    %188 = vector.shape_cast %187 : vector<16x32xf32> to vector<2x8x32xf32>
    %189 = vector.extract_strided_slice %186 {offsets = [0, 32], sizes = [16, 32], strides = [1, 1]} : vector<16x96xf32> to vector<16x32xf32>
    %190 = vector.shape_cast %189 : vector<16x32xf32> to vector<2x8x32xf32>
    %191 = vector.extract_strided_slice %186 {offsets = [0, 64], sizes = [16, 32], strides = [1, 1]} : vector<16x96xf32> to vector<16x32xf32>
    %192 = vector.shape_cast %191 : vector<16x32xf32> to vector<2x8x32xf32>
    %193 = vector.extract_strided_slice %188 {offsets = [0, 0, 0], sizes = [2, 8, 8], strides = [1, 1, 1]} : vector<2x8x32xf32> to vector<2x8x8xf32>
    %194 = vector.extract_strided_slice %190 {offsets = [0, 0, 0], sizes = [2, 8, 8], strides = [1, 1, 1]} : vector<2x8x32xf32> to vector<2x8x8xf32>
    "tpu.trace_start"() <{level = 10 : i32, message = "bqd,bkd->bqk"}> : () -> ()
    %cst_72 = arith.constant dense<0.000000e+00> : vector<2x8x8xf32>
    %195 = tpu.matmul %193, %194, %cst_72 {dimension_numbers = #tpu.dot_dimension_numbers<[2], [2], [1], [1], [0, 0, 0, 1, 1, 1], [0], [0]>} : vector<2x8x8xf32>, vector<2x8x8xf32>, vector<2x8x8xf32> -> vector<2x8x8xf32>
    "tpu.trace_stop"() : () -> ()
    %196 = arith.addf %195, %8 : vector<2x8x8xf32>
    %cst_73 = arith.constant dense<0xFF800000> : vector<2x8xf32>
    %197 = vector.multi_reduction <maximumf>, %196, %cst_73 [2] : vector<2x8x8xf32> to vector<2x8xf32>
    %198 = vector.shape_cast %197 : vector<2x8xf32> to vector<2x8x1xf32>
    %199 = vector.broadcast %198 : vector<2x8x1xf32> to vector<2x8x8xf32>
    %200 = arith.subf %196, %199 : vector<2x8x8xf32>
    %201 = math.exp %200 : vector<2x8x8xf32>
    %cst_74 = arith.constant dense<0.000000e+00> : vector<2x8xf32>
    %202 = vector.multi_reduction <add>, %201, %cst_74 [2] : vector<2x8x8xf32> to vector<2x8xf32>
    %203 = vector.shape_cast %202 : vector<2x8xf32> to vector<2x8x1xf32>
    %204 = tpu.reciprocal %203 {approx = true} : vector<2x8x1xf32> -> vector<2x8x1xf32>
    %205 = vector.broadcast %204 : vector<2x8x1xf32> to vector<2x8x8xf32>
    %206 = arith.mulf %201, %205 : vector<2x8x8xf32>
    %207 = vector.extract_strided_slice %192 {offsets = [0, 0, 0], sizes = [2, 8, 8], strides = [1, 1, 1]} : vector<2x8x32xf32> to vector<2x8x8xf32>
    "tpu.trace_start"() <{level = 10 : i32, message = "bqk,bkd->bqd"}> : () -> ()
    %cst_75 = arith.constant dense<0.000000e+00> : vector<2x8x8xf32>
    %208 = tpu.matmul %206, %207, %cst_75 {dimension_numbers = #tpu.dot_dimension_numbers<[2], [1], [1], [2], [0, 0, 0, 1, 1, 2], [0], [0]>} : vector<2x8x8xf32>, vector<2x8x8xf32>, vector<2x8x8xf32> -> vector<2x8x8xf32>
    "tpu.trace_stop"() : () -> ()
    %209 = vector.shape_cast %208 : vector<2x8x8xf32> to vector<16x8xf32>
    %c1_76 = arith.constant 1 : index
    %c0_77 = arith.constant 0 : index
    %c0_78 = arith.constant 0 : index
    %c0_79 = arith.constant 0 : index
    %210 = vector.load %arg3[%c1_76, %c0_77, %c0_78, %c0_79] : memref<2x4x8x32xf32, #tpu.memory_space<vmem>>, vector<1x1x8x32xf32>
    %211 = vector.shape_cast %210 : vector<1x1x8x32xf32> to vector<8x32xf32>
    %cst_80 = arith.constant dense<0.000000e+00> : vector<16x32xf32>
    %212 = tpu.matmul %209, %211, %cst_80 {dimension_numbers = #tpu.dot_dimension_numbers<[1], [0], [0], [1], [0, 0, 1, 1], [], []>} : vector<16x8xf32>, vector<8x32xf32>, vector<16x32xf32> -> vector<16x32xf32>
    %213 = vector.extract_strided_slice %188 {offsets = [0, 0, 8], sizes = [2, 8, 8], strides = [1, 1, 1]} : vector<2x8x32xf32> to vector<2x8x8xf32>
    %214 = vector.extract_strided_slice %190 {offsets = [0, 0, 8], sizes = [2, 8, 8], strides = [1, 1, 1]} : vector<2x8x32xf32> to vector<2x8x8xf32>
    "tpu.trace_start"() <{level = 10 : i32, message = "bqd,bkd->bqk"}> : () -> ()
    %cst_81 = arith.constant dense<0.000000e+00> : vector<2x8x8xf32>
    %215 = tpu.matmul %213, %214, %cst_81 {dimension_numbers = #tpu.dot_dimension_numbers<[2], [2], [1], [1], [0, 0, 0, 1, 1, 1], [0], [0]>} : vector<2x8x8xf32>, vector<2x8x8xf32>, vector<2x8x8xf32> -> vector<2x8x8xf32>
    "tpu.trace_stop"() : () -> ()
    %216 = arith.addf %215, %8 : vector<2x8x8xf32>
    %cst_82 = arith.constant dense<0xFF800000> : vector<2x8xf32>
    %217 = vector.multi_reduction <maximumf>, %216, %cst_82 [2] : vector<2x8x8xf32> to vector<2x8xf32>
    %218 = vector.shape_cast %217 : vector<2x8xf32> to vector<2x8x1xf32>
    %219 = vector.broadcast %218 : vector<2x8x1xf32> to vector<2x8x8xf32>
    %220 = arith.subf %216, %219 : vector<2x8x8xf32>
    %221 = math.exp %220 : vector<2x8x8xf32>
    %cst_83 = arith.constant dense<0.000000e+00> : vector<2x8xf32>
    %222 = vector.multi_reduction <add>, %221, %cst_83 [2] : vector<2x8x8xf32> to vector<2x8xf32>
    %223 = vector.shape_cast %222 : vector<2x8xf32> to vector<2x8x1xf32>
    %224 = tpu.reciprocal %223 {approx = true} : vector<2x8x1xf32> -> vector<2x8x1xf32>
    %225 = vector.broadcast %224 : vector<2x8x1xf32> to vector<2x8x8xf32>
    %226 = arith.mulf %221, %225 : vector<2x8x8xf32>
    %227 = vector.extract_strided_slice %192 {offsets = [0, 0, 8], sizes = [2, 8, 8], strides = [1, 1, 1]} : vector<2x8x32xf32> to vector<2x8x8xf32>
    "tpu.trace_start"() <{level = 10 : i32, message = "bqk,bkd->bqd"}> : () -> ()
    %cst_84 = arith.constant dense<0.000000e+00> : vector<2x8x8xf32>
    %228 = tpu.matmul %226, %227, %cst_84 {dimension_numbers = #tpu.dot_dimension_numbers<[2], [1], [1], [2], [0, 0, 0, 1, 1, 2], [0], [0]>} : vector<2x8x8xf32>, vector<2x8x8xf32>, vector<2x8x8xf32> -> vector<2x8x8xf32>
    "tpu.trace_stop"() : () -> ()
    %229 = vector.shape_cast %228 : vector<2x8x8xf32> to vector<16x8xf32>
    %c1_85 = arith.constant 1 : index
    %c1_86 = arith.constant 1 : index
    %c0_87 = arith.constant 0 : index
    %c0_88 = arith.constant 0 : index
    %230 = vector.load %arg3[%c1_85, %c1_86, %c0_87, %c0_88] : memref<2x4x8x32xf32, #tpu.memory_space<vmem>>, vector<1x1x8x32xf32>
    %231 = vector.shape_cast %230 : vector<1x1x8x32xf32> to vector<8x32xf32>
    %cst_89 = arith.constant dense<0.000000e+00> : vector<16x32xf32>
    %232 = tpu.matmul %229, %231, %cst_89 {dimension_numbers = #tpu.dot_dimension_numbers<[1], [0], [0], [1], [0, 0, 1, 1], [], []>} : vector<16x8xf32>, vector<8x32xf32>, vector<16x32xf32> -> vector<16x32xf32>
    %233 = arith.addf %212, %232 : vector<16x32xf32>
    %234 = vector.extract_strided_slice %188 {offsets = [0, 0, 16], sizes = [2, 8, 8], strides = [1, 1, 1]} : vector<2x8x32xf32> to vector<2x8x8xf32>
    %235 = vector.extract_strided_slice %190 {offsets = [0, 0, 16], sizes = [2, 8, 8], strides = [1, 1, 1]} : vector<2x8x32xf32> to vector<2x8x8xf32>
    "tpu.trace_start"() <{level = 10 : i32, message = "bqd,bkd->bqk"}> : () -> ()
    %cst_90 = arith.constant dense<0.000000e+00> : vector<2x8x8xf32>
    %236 = tpu.matmul %234, %235, %cst_90 {dimension_numbers = #tpu.dot_dimension_numbers<[2], [2], [1], [1], [0, 0, 0, 1, 1, 1], [0], [0]>} : vector<2x8x8xf32>, vector<2x8x8xf32>, vector<2x8x8xf32> -> vector<2x8x8xf32>
    "tpu.trace_stop"() : () -> ()
    %237 = arith.addf %236, %8 : vector<2x8x8xf32>
    %cst_91 = arith.constant dense<0xFF800000> : vector<2x8xf32>
    %238 = vector.multi_reduction <maximumf>, %237, %cst_91 [2] : vector<2x8x8xf32> to vector<2x8xf32>
    %239 = vector.shape_cast %238 : vector<2x8xf32> to vector<2x8x1xf32>
    %240 = vector.broadcast %239 : vector<2x8x1xf32> to vector<2x8x8xf32>
    %241 = arith.subf %237, %240 : vector<2x8x8xf32>
    %242 = math.exp %241 : vector<2x8x8xf32>
    %cst_92 = arith.constant dense<0.000000e+00> : vector<2x8xf32>
    %243 = vector.multi_reduction <add>, %242, %cst_92 [2] : vector<2x8x8xf32> to vector<2x8xf32>
    %244 = vector.shape_cast %243 : vector<2x8xf32> to vector<2x8x1xf32>
    %245 = tpu.reciprocal %244 {approx = true} : vector<2x8x1xf32> -> vector<2x8x1xf32>
    %246 = vector.broadcast %245 : vector<2x8x1xf32> to vector<2x8x8xf32>
    %247 = arith.mulf %242, %246 : vector<2x8x8xf32>
    %248 = vector.extract_strided_slice %192 {offsets = [0, 0, 16], sizes = [2, 8, 8], strides = [1, 1, 1]} : vector<2x8x32xf32> to vector<2x8x8xf32>
    "tpu.trace_start"() <{level = 10 : i32, message = "bqk,bkd->bqd"}> : () -> ()
    %cst_93 = arith.constant dense<0.000000e+00> : vector<2x8x8xf32>
    %249 = tpu.matmul %247, %248, %cst_93 {dimension_numbers = #tpu.dot_dimension_numbers<[2], [1], [1], [2], [0, 0, 0, 1, 1, 2], [0], [0]>} : vector<2x8x8xf32>, vector<2x8x8xf32>, vector<2x8x8xf32> -> vector<2x8x8xf32>
    "tpu.trace_stop"() : () -> ()
    %250 = vector.shape_cast %249 : vector<2x8x8xf32> to vector<16x8xf32>
    %c1_94 = arith.constant 1 : index
    %c2_95 = arith.constant 2 : index
    %c0_96 = arith.constant 0 : index
    %c0_97 = arith.constant 0 : index
    %251 = vector.load %arg3[%c1_94, %c2_95, %c0_96, %c0_97] : memref<2x4x8x32xf32, #tpu.memory_space<vmem>>, vector<1x1x8x32xf32>
    %252 = vector.shape_cast %251 : vector<1x1x8x32xf32> to vector<8x32xf32>
    %cst_98 = arith.constant dense<0.000000e+00> : vector<16x32xf32>
    %253 = tpu.matmul %250, %252, %cst_98 {dimension_numbers = #tpu.dot_dimension_numbers<[1], [0], [0], [1], [0, 0, 1, 1], [], []>} : vector<16x8xf32>, vector<8x32xf32>, vector<16x32xf32> -> vector<16x32xf32>
    %254 = arith.addf %233, %253 : vector<16x32xf32>
    %255 = vector.extract_strided_slice %188 {offsets = [0, 0, 24], sizes = [2, 8, 8], strides = [1, 1, 1]} : vector<2x8x32xf32> to vector<2x8x8xf32>
    %256 = vector.extract_strided_slice %190 {offsets = [0, 0, 24], sizes = [2, 8, 8], strides = [1, 1, 1]} : vector<2x8x32xf32> to vector<2x8x8xf32>
    "tpu.trace_start"() <{level = 10 : i32, message = "bqd,bkd->bqk"}> : () -> ()
    %cst_99 = arith.constant dense<0.000000e+00> : vector<2x8x8xf32>
    %257 = tpu.matmul %255, %256, %cst_99 {dimension_numbers = #tpu.dot_dimension_numbers<[2], [2], [1], [1], [0, 0, 0, 1, 1, 1], [0], [0]>} : vector<2x8x8xf32>, vector<2x8x8xf32>, vector<2x8x8xf32> -> vector<2x8x8xf32>
    "tpu.trace_stop"() : () -> ()
    %258 = arith.addf %257, %8 : vector<2x8x8xf32>
    %cst_100 = arith.constant dense<0xFF800000> : vector<2x8xf32>
    %259 = vector.multi_reduction <maximumf>, %258, %cst_100 [2] : vector<2x8x8xf32> to vector<2x8xf32>
    %260 = vector.shape_cast %259 : vector<2x8xf32> to vector<2x8x1xf32>
    %261 = vector.broadcast %260 : vector<2x8x1xf32> to vector<2x8x8xf32>
    %262 = arith.subf %258, %261 : vector<2x8x8xf32>
    %263 = math.exp %262 : vector<2x8x8xf32>
    %cst_101 = arith.constant dense<0.000000e+00> : vector<2x8xf32>
    %264 = vector.multi_reduction <add>, %263, %cst_101 [2] : vector<2x8x8xf32> to vector<2x8xf32>
    %265 = vector.shape_cast %264 : vector<2x8xf32> to vector<2x8x1xf32>
    %266 = tpu.reciprocal %265 {approx = true} : vector<2x8x1xf32> -> vector<2x8x1xf32>
    %267 = vector.broadcast %266 : vector<2x8x1xf32> to vector<2x8x8xf32>
    %268 = arith.mulf %263, %267 : vector<2x8x8xf32>
    %269 = vector.extract_strided_slice %192 {offsets = [0, 0, 24], sizes = [2, 8, 8], strides = [1, 1, 1]} : vector<2x8x32xf32> to vector<2x8x8xf32>
    "tpu.trace_start"() <{level = 10 : i32, message = "bqk,bkd->bqd"}> : () -> ()
    %cst_102 = arith.constant dense<0.000000e+00> : vector<2x8x8xf32>
    %270 = tpu.matmul %268, %269, %cst_102 {dimension_numbers = #tpu.dot_dimension_numbers<[2], [1], [1], [2], [0, 0, 0, 1, 1, 2], [0], [0]>} : vector<2x8x8xf32>, vector<2x8x8xf32>, vector<2x8x8xf32> -> vector<2x8x8xf32>
    "tpu.trace_stop"() : () -> ()
    %271 = vector.shape_cast %270 : vector<2x8x8xf32> to vector<16x8xf32>
    %c1_103 = arith.constant 1 : index
    %c3_104 = arith.constant 3 : index
    %c0_105 = arith.constant 0 : index
    %c0_106 = arith.constant 0 : index
    %272 = vector.load %arg3[%c1_103, %c3_104, %c0_105, %c0_106] : memref<2x4x8x32xf32, #tpu.memory_space<vmem>>, vector<1x1x8x32xf32>
    %273 = vector.shape_cast %272 : vector<1x1x8x32xf32> to vector<8x32xf32>
    %cst_107 = arith.constant dense<0.000000e+00> : vector<16x32xf32>
    %274 = tpu.matmul %271, %273, %cst_107 {dimension_numbers = #tpu.dot_dimension_numbers<[1], [0], [0], [1], [0, 0, 1, 1], [], []>} : vector<16x8xf32>, vector<8x32xf32>, vector<16x32xf32> -> vector<16x32xf32>
    %275 = arith.addf %254, %274 : vector<16x32xf32>
    %276 = vector.extract_strided_slice %180 {offsets = [1, 0], sizes = [1, 32], strides = [1, 1]} : vector<8x128xf32> to vector<1x32xf32>
    %277 = vector.broadcast %276 : vector<1x32xf32> to vector<16x32xf32>
    %278 = arith.addf %275, %277 : vector<16x32xf32>
    %279 = arith.addf %178, %278 : vector<16x32xf32>
    %280 = vector.extract_strided_slice %180 {offsets = [4, 0], sizes = [1, 32], strides = [1, 1]} : vector<8x128xf32> to vector<1x32xf32>
    %281 = vector.extract_strided_slice %180 {offsets = [5, 0], sizes = [1, 32], strides = [1, 1]} : vector<8x128xf32> to vector<1x32xf32>
    %cst_108 = arith.constant dense<0.000000e+00> : vector<16xf32>
    %282 = vector.multi_reduction <add>, %279, %cst_108 [1] : vector<16x32xf32> to vector<16xf32>
    %283 = vector.shape_cast %282 : vector<16xf32> to vector<16x1xf32>
    %cst_109 = arith.constant 3.200000e+01 : f32
    %284 = vector.broadcast %cst_109 : f32 to vector<16x1xf32>
    %285 = arith.divf %283, %284 : vector<16x1xf32>
    %286 = vector.broadcast %285 : vector<16x1xf32> to vector<16x32xf32>
    %287 = arith.subf %279, %286 : vector<16x32xf32>
    %288 = arith.mulf %287, %287 : vector<16x32xf32>
    %cst_110 = arith.constant dense<0.000000e+00> : vector<16xf32>
    %289 = vector.multi_reduction <add>, %288, %cst_110 [1] : vector<16x32xf32> to vector<16xf32>
    %290 = vector.shape_cast %289 : vector<16xf32> to vector<16x1xf32>
    %cst_111 = arith.constant 3.200000e+01 : f32
    %291 = vector.broadcast %cst_111 : f32 to vector<16x1xf32>
    %292 = arith.divf %290, %291 : vector<16x1xf32>
    %293 = vector.broadcast %285 : vector<16x1xf32> to vector<16x32xf32>
    %294 = arith.subf %279, %293 : vector<16x32xf32>
    %cst_112 = arith.constant 9.99999974E-6 : f32
    %295 = vector.broadcast %cst_112 : f32 to vector<16x1xf32>
    %296 = arith.addf %292, %295 : vector<16x1xf32>
    %297 = math.rsqrt %296 : vector<16x1xf32>
    %298 = vector.broadcast %297 : vector<16x1xf32> to vector<16x32xf32>
    %299 = arith.mulf %294, %298 : vector<16x32xf32>
    %300 = vector.broadcast %280 : vector<1x32xf32> to vector<16x32xf32>
    %301 = arith.mulf %299, %300 : vector<16x32xf32>
    %302 = vector.broadcast %281 : vector<1x32xf32> to vector<16x32xf32>
    %303 = arith.addf %301, %302 : vector<16x32xf32>
    %c1_113 = arith.constant 1 : index
    %c0_114 = arith.constant 0 : index
    %c0_115 = arith.constant 0 : index
    %304 = vector.load %arg4[%c1_113, %c0_114, %c0_115] : memref<2x32x64xf32, #tpu.memory_space<vmem>>, vector<1x32x64xf32>
    %305 = vector.shape_cast %304 : vector<1x32x64xf32> to vector<32x64xf32>
    %cst_116 = arith.constant dense<0.000000e+00> : vector<16x64xf32>
    %306 = tpu.matmul %303, %305, %cst_116 {dimension_numbers = #tpu.dot_dimension_numbers<[1], [0], [0], [1], [0, 0, 1, 1], [], []>} : vector<16x32xf32>, vector<32x64xf32>, vector<16x64xf32> -> vector<16x64xf32>
    %307 = vector.extract_strided_slice %180 {offsets = [2, 0], sizes = [1, 64], strides = [1, 1]} : vector<8x128xf32> to vector<1x64xf32>
    %308 = vector.broadcast %307 : vector<1x64xf32> to vector<16x64xf32>
    %309 = arith.addf %306, %308 : vector<16x64xf32>
    %cst_117 = arith.constant 0.000000e+00 : f32
    %310 = vector.broadcast %cst_117 : f32 to vector<16x64xf32>
    %311 = arith.subf %310, %309 : vector<16x64xf32>
    %312 = math.exp %311 : vector<16x64xf32>
    %cst_118 = arith.constant 1.000000e+00 : f32
    %313 = vector.broadcast %cst_118 : f32 to vector<16x64xf32>
    %314 = arith.addf %313, %312 : vector<16x64xf32>
    %cst_119 = arith.constant 1.000000e+00 : f32
    %315 = vector.broadcast %cst_119 : f32 to vector<16x64xf32>
    %316 = arith.divf %315, %314 : vector<16x64xf32>
    %317 = arith.mulf %309, %316 : vector<16x64xf32>
    %c1_120 = arith.constant 1 : index
    %c0_121 = arith.constant 0 : index
    %c0_122 = arith.constant 0 : index
    %318 = vector.load %arg5[%c1_120, %c0_121, %c0_122] : memref<2x64x32xf32, #tpu.memory_space<vmem>>, vector<1x64x32xf32>
    %319 = vector.shape_cast %318 : vector<1x64x32xf32> to vector<64x32xf32>
    %cst_123 = arith.constant dense<0.000000e+00> : vector<16x32xf32>
    %320 = tpu.matmul %317, %319, %cst_123 {dimension_numbers = #tpu.dot_dimension_numbers<[1], [0], [0], [1], [0, 0, 1, 1], [], []>} : vector<16x64xf32>, vector<64x32xf32>, vector<16x32xf32> -> vector<16x32xf32>
    %321 = vector.extract_strided_slice %180 {offsets = [3, 0], sizes = [1, 32], strides = [1, 1]} : vector<8x128xf32> to vector<1x32xf32>
    %322 = vector.broadcast %321 : vector<1x32xf32> to vector<16x32xf32>
    %323 = arith.addf %320, %322 : vector<16x32xf32>
    %324 = arith.addf %303, %323 : vector<16x32xf32>
    %325 = vector.extract_strided_slice %180 {offsets = [6, 0], sizes = [1, 32], strides = [1, 1]} : vector<8x128xf32> to vector<1x32xf32>
    %326 = vector.extract_strided_slice %180 {offsets = [7, 0], sizes = [1, 32], strides = [1, 1]} : vector<8x128xf32> to vector<1x32xf32>
    %cst_124 = arith.constant dense<0.000000e+00> : vector<16xf32>
    %327 = vector.multi_reduction <add>, %324, %cst_124 [1] : vector<16x32xf32> to vector<16xf32>
    %328 = vector.shape_cast %327 : vector<16xf32> to vector<16x1xf32>
    %cst_125 = arith.constant 3.200000e+01 : f32
    %329 = vector.broadcast %cst_125 : f32 to vector<16x1xf32>
    %330 = arith.divf %328, %329 : vector<16x1xf32>
    %331 = vector.broadcast %330 : vector<16x1xf32> to vector<16x32xf32>
    %332 = arith.subf %324, %331 : vector<16x32xf32>
    %333 = arith.mulf %332, %332 : vector<16x32xf32>
    %cst_126 = arith.constant dense<0.000000e+00> : vector<16xf32>
    %334 = vector.multi_reduction <add>, %333, %cst_126 [1] : vector<16x32xf32> to vector<16xf32>
    %335 = vector.shape_cast %334 : vector<16xf32> to vector<16x1xf32>
    %cst_127 = arith.constant 3.200000e+01 : f32
    %336 = vector.broadcast %cst_127 : f32 to vector<16x1xf32>
    %337 = arith.divf %335, %336 : vector<16x1xf32>
    %338 = vector.broadcast %330 : vector<16x1xf32> to vector<16x32xf32>
    %339 = arith.subf %324, %338 : vector<16x32xf32>
    %cst_128 = arith.constant 9.99999974E-6 : f32
    %340 = vector.broadcast %cst_128 : f32 to vector<16x1xf32>
    %341 = arith.addf %337, %340 : vector<16x1xf32>
    %342 = math.rsqrt %341 : vector<16x1xf32>
    %343 = vector.broadcast %342 : vector<16x1xf32> to vector<16x32xf32>
    %344 = arith.mulf %339, %343 : vector<16x32xf32>
    %345 = vector.broadcast %325 : vector<1x32xf32> to vector<16x32xf32>
    %346 = arith.mulf %344, %345 : vector<16x32xf32>
    %347 = vector.broadcast %326 : vector<1x32xf32> to vector<16x32xf32>
    %348 = arith.addf %346, %347 : vector<16x32xf32>
    %c0_129 = arith.constant 0 : index
    %c0_130 = arith.constant 0 : index
    %349 = vector.load %arg7[%c0_129, %c0_130] : memref<16x32xf32, #tpu.memory_space<vmem>>, vector<16x32xf32>
    tpu.vector_store %arg7[%c0_129, %c0_130], %348 {strides = array<i32>} : memref<16x32xf32, #tpu.memory_space<vmem>>, vector<16x32xf32>,
    return
  }
}

</mosaic_0001>

<bundles_post_ra>
// kernel: forward.1
= control target key start
LH: loop header
LB: loop body
LE: loop exit
PB: predicated region body
PF: predicated region fallthrough
CT: control target
= control target key end

     0   :  { %s2646_s0 = inlined_call_operand.vmem [shape: f32[16,32], index: 0, kind: input, shape index: {}]   ;;  %s2647_s1 = inlined_call_operand.vmem [shape: f32[2,8], index: 1, kind: input, shape index: {}]   ;;  %s2648_s2 = inlined_call_operand.vmem [shape: f32[2,32,96], index: 2, kind: input, shape index: {}]   ;;  %s2649_s3 = inlined_call_operand.vmem [shape: f32[2,4,8,32], index: 3, kind: input, shape index: {}]   ;;  %s2650_s4 = inlined_call_operand.vmem [shape: f32[2,32,64], index: 4, kind: input, shape index: {}]   ;;  %s2651_s5 = inlined_call_operand.vmem [shape: f32[2,64,32], index: 5, kind: input, shape index: {}]   ;;  %s2652_s6 = inlined_call_operand.vmem [shape: f32[2,8,128], index: 6, kind: input, shape index: {}]   ;;  %s2653_s7 = inlined_call_operand.hbm [shape: f32[16,32], index: 7, kind: output, shape index: {}]  }
   0x1   :  { %v42_v0 = vld [vmem:[%s2648_s2 + $0x18] sm:$0xff]  ;;  %v41_v1 = vld [vmem:[%s2648_s2 + $0x10] sm:$0xff]  ;;  %v40_v2 = vld [vmem:[%s2648_s2 + $0x8] sm:$0xff] }
   0x2   :  { %63 = vmatpush.msra.mxu0 %v42_v0 }
   0x3   :  { %12 = vsyncpa [#allocation3], 0  ;;  %v39_v3 = vld [vmem:[%s2648_s2] sm:$0xff]  ;;  %vm44_vm0 = vcmask 261120   ;;  %v2187_v5 = vld [vmem:[%s2646_s0 + $0x8] sm:$0xff]  ;;  %s2110_s15 = smov 64  }
   0x4   :  { %64 = vmatpush.msra.mxu0 %v41_v1  ;;  %v2180_v4 = vld [vmem:[%s2646_s0] sm:$0xff]  ;;  %s2111_s16 = smov 96   ;;  %s2112_s0 = smov 88   ;;  %vm77_vm1 = vcmask 64512   ;;  %vm865_vm10 = vcmask 523264  }
   0x5   :  { %v2194_v6 = vld [vmem:[%s2652_s6] sm:$0xff]  ;;  %s2113_s17 = smov 120   ;;  %s2115_s20 = smov 56  }
   0x6   :  { %65 = vmatpush.msra.mxu0 %v40_v2  ;;  %v43_v7 = vperm.slane %v2194_v6, 0  ;;  %v29_v16 = vld [vmem:[%s2647_s1] sm:$0x3]  ;;  %s2114_s1 = smov 112   ;;  %s2116_s21 = smov 80  }
   0x7   :  { %v30_v17 = vsub.f32 1.0, %v29_v16  ;;  %s2117_s22 = smov 104   ;;  %v203_v47 = vld [vmem:[%s2649_s3] sm:$0xff]  ;;  %s2118_s25 = smov 72  }
   0x8   :  { %66 = vmatpush.msra.mxu0 %v39_v3  ;;  %s2119_s28 = smov 48   ;;  %s2120_s29 = smov 40  }
   0x9   :  { %1871 = vmatmul.msk.f32.vlgmr.msra.gmra.mxu0 %vm44_vm0, %v2180_v4  ;;  %v31_v18 = vmul.f32 -1e+09, %v30_v17 }
   0xa   :  { %386 = vmatpush.msrb.mxu0 %v203_v47 }
   0xb   :  { %v2225_v19 = vperm.slane %v31_v18, 0  ;;  %v33_v23 = vrot.slane %v31_v18, 1 }
   0xd   :  { %v2229_v24 = vperm.slane %v33_v23, 0  ;;  %v1885_v23 = vld [vmem:[%s2649_s3 + $0x8] sm:$0xff] }
  0x11   :  { %1872 = vmatmul.msk.f32.gmra.mxu0 %vm44_vm0, %v2187_v5 }
  0x86   :  { %v68_v8 = vpop.f32.mrf.mxu0 }
  0x87   :  { %v2197_v9 = vadd.f32 %v68_v8, %v43_v7 }
  0x89   :  { %151 = vrot.lane.b32.xlu2 %v2197_v9, %s2110_s15  ;;  %75 = vrot.lane.b32.xlu0 %v2197_v9, %s2111_s16 }
  0x8e   :  { %v71_v10 = vpop.f32.mrf.mxu0 }
  0x8f   :  { %v2203_v11 = vadd.f32 %v71_v10, %v43_v7 }
  0x91   :  { %103 = vrot.lane.b32.xlu1 %v2203_v11, %s2111_s16  ;;  %206 = vrot.lane.b32.xlu2 %v2197_v9, %s2112_s0 }
  0x99   :  { %204 = vrot.lane.b32.xlu2 %v2197_v9, %s2113_s17 }
  0xa1   :  { %234 = vrot.lane.b32.xlu2 %v2203_v11, %s2112_s0 }
  0xa9   :  { %232 = vrot.lane.b32.xlu2 %v2203_v11, %s2113_s17 }
  0xe3   :  { %v152_v12 = vpop.permute.xlu2 %151 }
  0xeb   :  { %v207_v14 = vpop.permute.xlu2 %206 }
  0xf3   :  { %v205_v28 = vpop.permute.xlu2 %204 }
  0xfb   :  { %v76_v13 = vpop.permute.xlu0 %75  ;;  %v235_v29 = vpop.permute.xlu2 %234 }
  0xfc   :  { %1873 = vmatpush.xpose.msk.msra.mxu1 %vm77_vm1, %v76_v13 }
  0xff   :  { %1874 = vmatmul.msk.f32.vlgmr.msra.gmra.mxu1 %vm77_vm1, %v2197_v9 }
 0x100   :  { %172 = vmatpush.msrb.mxu1 %v152_v12 }
 0x102   :  { %1879 = vmatpush.xpose.msk.msra.mxu1 %vm77_vm1, %v207_v14 }
 0x103   :  { %v104_v15 = vpop.permute.xlu1 %103  ;;  %v233_v30 = vpop.permute.xlu2 %232 }
 0x104   :  { %1875 = vmatpush.xpose.msk.msra.mxu2 %vm77_vm1, %v104_v15 }
 0x107   :  { %1876 = vmatmul.msk.f32.vlgmr.msra.gmra.mxu2 %vm77_vm1, %v2203_v11 }
 0x108   :  { %1881 = vmatpush.xpose.msk.msrb.mxu2 %vm77_vm1, %v235_v29 }
 0x10c   :  { %357 = vmatpush.msra.mxu2 %v1885_v23 }
 0x10f   :  { %1882 = vmatmul.msk.f32.vlgmr.msrb.gmra.mxu2 %vm77_vm1, %v233_v30 }
 0x17c   :  { %v99_v20 = vpop.f32.mrf.mxu1 }
 0x17d   :  { %v100_v21 = vadd.f32 %v99_v20, %v2225_v19 }
 0x17f   :  { %v129_v22 = vsel %vm77_vm1, %v100_v21, -inf }
 0x180   :  { %130 = vmax.xlane.f32.xlu0 %v129_v22 }
 0x18a   :  { %v126_v25 = vpop.f32.mrf.mxu2 }
 0x18b   :  { %v127_v26 = vadd.f32 %v126_v25, %v2229_v24 }
 0x18d   :  { %v132_v27 = vsel %vm77_vm1, %v127_v26, -inf }
 0x18e   :  { %133 = vmax.xlane.f32.xlu2 %v132_v27 }
 0x192   :  { %v257_v52 = vpop.f32.mrf.mxu2 }
 0x193   :  { %v258_v53 = vadd.f32 %v257_v52, %v2229_v24 }
 0x195   :  { %v263_v54 = vsel %vm77_vm1, %v258_v53, -inf }
 0x1a6   :  { %394 = vrot.lane.b32.xlu2 %v2197_v9, %s2114_s1 }
 0x1ae   :  { %308 = vrot.lane.b32.xlu2 %v2203_v11, %s2115_s20 }
 0x1b6   :  { %424 = vrot.lane.b32.xlu2 %v2203_v11, %s2116_s21 }
 0x1be   :  { %422 = vrot.lane.b32.xlu2 %v2203_v11, %s2114_s1 }
 0x1c6   :  { %557 = vrot.lane.b32.xlu2 %v2197_v9, %s2117_s22 }
 0x1f3   :  { %v131_v31 = vpop.xlane.xlu0 %130 }
 0x1f4   :  { %v135_v32 = vsub.f32 %v100_v21, %v131_v31 }
 0x1f6   :  { %v137_v33 = vmul.f32 1.442695, %v135_v32 }
 0x1f8   :  { %1986 = vpow2.f32 %v137_v33 }
 0x1fe   :  { %v1987_v34 = vpop.eup %1986 }
 0x1ff   :  { %v141_v35 = vsel %vm77_vm1, %v1987_v34, 0.0 }
 0x200   :  { %142 = vadd.xlane.f32.xlu1 %v141_v35 }
 0x201   :  { %v134_v36 = vpop.xlane.xlu2 %133 }
 0x202   :  { %v136_v37 = vsub.f32 %v127_v26, %v134_v36 }
 0x204   :  { %v139_v38 = vmul.f32 1.442695, %v136_v37 }
 0x206   :  { %1988 = vpow2.f32 %v139_v38 }
 0x209   :  { %v2247_v41 = vpop.permute.xlu2 %394 }
 0x20c   :  { %v1989_v39 = vpop.eup %1988 }
 0x20d   :  { %v144_v40 = vsel %vm77_vm1, %v1989_v39, 0.0 }
 0x20e   :  { %145 = vadd.xlane.f32.xlu1 %v144_v40 }
 0x211   :  { %v309_v44 = vpop.permute.xlu2 %308 }
 0x219   :  { %v425_v46 = vpop.permute.xlu2 %424 }
 0x221   :  { %v423_v14 = vpop.permute.xlu2 %422 }
 0x229   :  { %v558_v18 = vpop.permute.xlu2 %557 }
 0x273   :  { %v143_v42 = vpop.xlane.xlu1 %142 }
 0x274   :  { %1990 = vrcp.f32 %v143_v42 }
 0x27a   :  { %v1991_v43 = vpop.eup %1990 }
 0x27b   :  { %v149_v45 = vmul.f32 %v1991_v43, %v1987_v34 }
 0x27d   :  { %1877 = vmatmul.msk.f32.vlgmr.msrb.gmra.mxu1 %vm77_vm1, %v149_v45 }
 0x27e   :  { %329 = vmatpush.msrb.mxu1 %v309_v44 }
 0x281   :  { %v146_v58 = vpop.xlane.xlu1 %145 }
 0x285   :  { %1880 = vmatmul.msk.f32.vlgmr.msra.gmra.mxu1 %vm77_vm1, %v205_v28 }
 0x286   :  { %1892 = vmatpush.xpose.msk.msra.mxu1 %vm77_vm1, %v425_v46 }
 0x2fa   :  { %v174_v48 = vpop.f32.mrf.mxu1 }
 0x2fb   :  { %1888 = vmatmul.msk.f32.vlgmr.msrb.gmra.mxu0 %vm77_vm1, %v174_v48 }
 0x302   :  { %v229_v49 = vpop.f32.mrf.mxu1 }
 0x303   :  { %v230_v50 = vadd.f32 %v229_v49, %v2225_v19 }
 0x305   :  { %v260_v51 = vsel %vm77_vm1, %v230_v50, -inf }
 0x306   :  { %261 = vmax.xlane.f32.xlu0 %v260_v51 }
 0x31a   :  { %177 = vrot.lane.b32.xlu0 %v2203_v11, %s2110_s15 }
 0x322   :  { %396 = vrot.lane.b32.xlu0 %v2197_v9, %s2116_s21 }
 0x34c   :  { %264 = vmax.xlane.f32.xlu0 %v263_v54 }
 0x360   :  { %559 = vrot.lane.b32.xlu0 %v2197_v9, %s2118_s25 }
 0x368   :  { %587 = vrot.lane.b32.xlu0 %v2203_v11, %s2118_s25 }
 0x370   :  { %585 = vrot.lane.b32.xlu0 %v2203_v11, %s2117_s22 }
 0x378   :  { %v2293_v30 = vpop.f32.mrf.mxu0 }
 0x379   :  { %v262_v55 = vpop.xlane.xlu0 %261 }
 0x37a   :  { %v266_v56 = vsub.f32 %v230_v50, %v262_v55 }
 0x37c   :  { %v268_v57 = vmul.f32 1.442695, %v266_v56 }
 0x37e   :  { %1992 = vpow2.f32 %v268_v57 }
 0x37f   :  { %1994 = vrcp.f32 %v146_v58 }
 0x384   :  { %v1993_v59 = vpop.eup %1992 }
 0x385   :  { %v272_v60 = vsel %vm77_vm1, %v1993_v59, 0.0  ;;  %v1995_v61 = vpop.eup %1994 }
 0x386   :  { %273 = vadd.xlane.f32.xlu1 %v272_v60  ;;  %v150_v63 = vmul.f32 %v1995_v61, %v1989_v39 }
 0x38c   :  { %v178_v62 = vpop.permute.xlu0 %177 }
 0x38d   :  { %198 = vmatpush.msra.mxu3 %v178_v62 }
 0x38e   :  { %1878 = vmatmul.msk.f32.vlgmr.msra.gmra.mxu3 %vm77_vm1, %v150_v63 }
 0x394   :  { %v397_v0 = vpop.permute.xlu0 %396 }
 0x39f   :  { %282 = vrot.lane.b32.xlu1 %v2197_v9, %s2115_s20 }
 0x3bf   :  { %v265_v1 = vpop.xlane.xlu0 %264 }
 0x3c0   :  { %v267_v2 = vsub.f32 %v258_v53, %v265_v1 }
 0x3c2   :  { %v270_v3 = vmul.f32 1.442695, %v267_v2  ;;  %v1896_v2 = vld [vmem:[%s2649_s3 + $0x10] sm:$0xff] }
 0x3c3   :  { %547 = vmatpush.msrb.mxu2 %v1896_v2 }
 0x3c4   :  { %1996 = vpow2.f32 %v270_v3 }
 0x3ca   :  { %v1997_v7 = vpop.eup %1996 }
 0x3cb   :  { %v275_v8 = vsel %vm77_vm1, %v1997_v7, 0.0 }
 0x3cc   :  { %276 = vadd.xlane.f32.xlu1 %v275_v8 }
 0x3d2   :  { %v560_v10 = vpop.permute.xlu0 %559 }
 0x3d3   :  { %1899 = vmatpush.xpose.msk.msra.mxu0 %vm77_vm1, %v560_v10 }
 0x3da   :  { %v588_v44 = vpop.permute.xlu0 %587 }
 0x3e2   :  { %v586_v45 = vpop.permute.xlu0 %585 }
 0x3f9   :  { %v274_v12 = vpop.xlane.xlu1 %273 }
 0x3fa   :  { %1998 = vrcp.f32 %v274_v12  ;;  %v1905_v12 = vld [vmem:[%s2649_s3 + $0x18] sm:$0xff] }
 0x400   :  { %v1999_v13 = vpop.eup %1998 }
 0x401   :  { %v280_v17 = vmul.f32 %v1999_v13, %v1993_v59 }
 0x411   :  { %v200_v15 = vpop.f32.mrf.mxu3  ;;  %v283_v16 = vpop.permute.xlu1 %282 }
 0x412   :  { %303 = vmatpush.msrb.mxu3 %v283_v16  ;;  %1889 = vmatmul.msk.f32.gmra.mxu0 %vm77_vm1, %v200_v15 }
 0x413   :  { %1883 = vmatmul.msk.f32.vlgmr.msrb.gmra.mxu3 %vm77_vm1, %v280_v17 }
 0x414   :  { %1890 = vmatpush.xpose.msk.msra.mxu3 %vm77_vm1, %v397_v0 }
 0x41a   :  { %1900 = vmatmul.msk.f32.vlgmr.msra.gmra.mxu0 %vm77_vm1, %v558_v18 }
 0x41b   :  { %1891 = vmatmul.msk.f32.vlgmr.msra.gmra.mxu3 %vm77_vm1, %v2247_v41 }
 0x43f   :  { %v277_v20 = vpop.xlane.xlu1 %276 }
 0x440   :  { %2000 = vrcp.f32 %v277_v20 }
 0x446   :  { %v2001_v21 = vpop.eup %2000 }
 0x447   :  { %v281_v22 = vmul.f32 %v2001_v21, %v1997_v7 }
 0x449   :  { %1884 = vmatmul.msk.f32.vlgmr.msrb.gmra.mxu1 %vm77_vm1, %v281_v22 }
 0x451   :  { %1893 = vmatmul.msk.f32.vlgmr.msra.gmra.mxu1 %vm77_vm1, %v423_v14 }
 0x48f   :  { %v2297_v34 = vpop.f32.mrf.mxu0 }
 0x496   :  { %v305_v25 = vpop.f32.mrf.mxu3 }
 0x497   :  { %1886 = vmatmul.msk.f32.vlgmr.msra.gmra.mxu2 %vm77_vm1, %v305_v25  ;;  %v582_v35 = vpop.f32.mrf.mxu0 }
 0x498   :  { %v583_v36 = vadd.f32 %v582_v35, %v2225_v19 }
 0x49a   :  { %v613_v37 = vsel %vm77_vm1, %v583_v36, -inf }
 0x49e   :  { %v419_v26 = vpop.f32.mrf.mxu3 }
 0x49f   :  { %v420_v27 = vadd.f32 %v419_v26, %v2225_v19 }
 0x4a1   :  { %v450_v28 = vsel %vm77_vm1, %v420_v27, -inf }
 0x4a2   :  { %451 = vmax.xlane.f32.xlu1 %v450_v28 }
 0x4bb   :  { %472 = vrot.lane.b32.xlu1 %v2197_v9, %s2119_s28 }
 0x4c6   :  { %v331_v29 = vpop.f32.mrf.mxu1 }
 0x4c7   :  { %1887 = vmatmul.msk.f32.gmra.mxu2 %vm77_vm1, %v331_v29 }
 0x4ce   :  { %v447_v31 = vpop.f32.mrf.mxu1 }
 0x4cf   :  { %v448_v32 = vadd.f32 %v447_v31, %v2229_v24 }
 0x4d1   :  { %v453_v33 = vsel %vm77_vm1, %v448_v32, -inf }
 0x4d2   :  { %454 = vmax.xlane.f32.xlu0 %v453_v33 }
 0x4e5   :  { %614 = vmax.xlane.f32.xlu1 %v613_v37 }
 0x4e6   :  { %635 = vrot.lane.b32.xlu0 %v2197_v9, %s2120_s29 }
 0x515   :  { %v452_v38 = vpop.xlane.xlu1 %451 }
 0x516   :  { %v456_v39 = vsub.f32 %v420_v27, %v452_v38  ;;  %v720_v27 = vperm.slane %v2194_v6, 1  ;;  %v2121_v38 = vmov 32.0  }
 0x518   :  { %v458_v40 = vmul.f32 1.442695, %v456_v39 }
 0x51a   :  { %2002 = vpow2.f32 %v458_v40  ;;  %v359_v21 = vpop.f32.mrf.mxu2 }
 0x51b   :  { %v389_v25 = vadd.f32 %v2293_v30, %v359_v21 }
 0x520   :  { %v2003_v41 = vpop.eup %2002 }
 0x521   :  { %v462_v42 = vsel %vm77_vm1, %v2003_v41, 0.0 }
 0x522   :  { %463 = vadd.xlane.f32.xlu2 %v462_v42 }
 0x52d   :  { %v473_v43 = vpop.permute.xlu1 %472 }
 0x52e   :  { %493 = vmatpush.msrb.mxu3 %v473_v43 }
 0x530   :  { %1901 = vmatpush.xpose.msk.msra.mxu3 %vm77_vm1, %v588_v44 }
 0x545   :  { %v455_v46 = vpop.xlane.xlu0 %454 }
 0x546   :  { %v457_v47 = vsub.f32 %v448_v32, %v455_v46 }
 0x548   :  { %v460_v48 = vmul.f32 1.442695, %v457_v47 }
 0x54a   :  { %2004 = vpow2.f32 %v460_v48  ;;  %v362_v22 = vpop.f32.mrf.mxu2 }
 0x550   :  { %v2005_v49 = vpop.eup %2004 }
 0x551   :  { %v465_v9 = vsel %vm77_vm1, %v2005_v49, 0.0 }
 0x552   :  { %466 = vadd.xlane.f32.xlu2 %v465_v9  ;;  %v784_v9 = vld [vmem:[%s2650_s4 + $0x10] sm:$0xff] }
 0x558   :  { %v615_v50 = vpop.xlane.xlu1 %614  ;;  %v636_v63 = vpop.permute.xlu0 %635 }
 0x559   :  { %v619_v51 = vsub.f32 %v583_v36, %v615_v50  ;;  %v783_v50 = vld [vmem:[%s2650_s4 + $0x8] sm:$0xff] }
 0x55b   :  { %v621_v52 = vmul.f32 1.442695, %v619_v51  ;;  %v782_v51 = vld [vmem:[%s2650_s4] sm:$0xff] }
 0x55d   :  { %2006 = vpow2.f32 %v621_v52 }
 0x563   :  { %v2007_v53 = vpop.eup %2006 }
 0x564   :  { %v625_v54 = vsel %vm77_vm1, %v2007_v53, 0.0 }
 0x565   :  { %626 = vadd.xlane.f32.xlu2 %v625_v54 }
 0x57d   :  { %498 = vrot.lane.b32.xlu2 %v2203_v11, %s2119_s28 }
 0x585   :  { %661 = vrot.lane.b32.xlu2 %v2203_v11, %s2120_s29 }
 0x595   :  { %v464_v55 = vpop.xlane.xlu2 %463 }
 0x596   :  { %2008 = vrcp.f32 %v464_v55 }
 0x59c   :  { %v2009_v56 = vpop.eup %2008 }
 0x59d   :  { %v470_v57 = vmul.f32 %v2009_v56, %v2003_v41 }
 0x59f   :  { %1894 = vmatmul.msk.f32.vlgmr.msrb.gmra.mxu3 %vm77_vm1, %v470_v57 }
 0x5a0   :  { %710 = vmatpush.msrb.mxu3 %v1905_v12 }
 0x5a7   :  { %1902 = vmatmul.msk.f32.vlgmr.msra.gmra.mxu3 %vm77_vm1, %v586_v45 }
 0x5c5   :  { %v467_v58 = vpop.xlane.xlu2 %466 }
 0x5c6   :  { %2010 = vrcp.f32 %v467_v58 }
 0x5cc   :  { %v2011_v60 = vpop.eup %2010 }
 0x5cd   :  { %v471_v61 = vmul.f32 %v2011_v60, %v2005_v49  ;;  %v785_v49 = vld [vmem:[%s2650_s4 + $0x18] sm:$0xff] }
 0x5d8   :  { %v627_v59 = vpop.xlane.xlu2 %626 }
 0x5d9   :  { %2012 = vrcp.f32 %v627_v59 }
 0x5df   :  { %v2013_v11 = vpop.eup %2012 }
 0x5e0   :  { %v499_v62 = vpop.permute.xlu2 %498  ;;  %v633_v0 = vmul.f32 %v2013_v11, %v2007_v53  ;;  %v779_v11 = vperm.slane %v2194_v6, 5 }
 0x5e1   :  { %519 = vmatpush.msrb.mxu1 %v499_v62 }
 0x5e2   :  { %1895 = vmatmul.msk.f32.vlgmr.msrb.gmra.mxu1 %vm77_vm1, %v471_v61  ;;  %v776_v61 = vperm.slane %v2194_v6, 4 }
 0x5e3   :  { %656 = vmatpush.msra.mxu1 %v636_v63 }
 0x5e5   :  { %805 = vmatpush.msrb.mxu1 %v785_v49 }
 0x5e7   :  { %806 = vmatpush.msrb.mxu1 %v784_v9 }
 0x5e8   :  { %v662_v1 = vpop.permute.xlu2 %661 }
 0x5e9   :  { %682 = vmatpush.msrb.mxu0 %v662_v1  ;;  %807 = vmatpush.msrb.mxu1 %v783_v50 }
 0x5ea   :  { %1903 = vmatmul.msk.f32.vlgmr.msra.gmra.mxu1 %vm77_vm1, %v633_v0 }
 0x5eb   :  { %808 = vmatpush.msrb.mxu1 %v782_v51 }
 0x622   :  { %v495_v3 = vpop.f32.mrf.mxu3 }
 0x623   :  { %1897 = vmatmul.msk.f32.vlgmr.msrb.gmra.mxu2 %vm77_vm1, %v495_v3  ;;  %v392_v3 = vadd.f32 %v2297_v34, %v362_v22  ;;  %v861_v34 = vld [vmem:[%s2651_s5 + $0x28] sm:$0xff] }
 0x624   :  { %v857_v22 = vld [vmem:[%s2651_s5 + $0x8] sm:$0xff] }
 0x62a   :  { %v610_v7 = vpop.f32.mrf.mxu3 }
 0x62b   :  { %v611_v8 = vadd.f32 %v610_v7, %v2229_v24 }
 0x62d   :  { %v616_v10 = vsel %vm77_vm1, %v611_v8, -inf }
 0x62e   :  { %617 = vmax.xlane.f32.xlu1 %v616_v10 }
 0x65f   :  { %v521_v13 = vpop.f32.mrf.mxu1 }
 0x660   :  { %1898 = vmatmul.msk.f32.gmra.mxu2 %vm77_vm1, %v521_v13 }
 0x667   :  { %v658_v14 = vpop.f32.mrf.mxu1 }
 0x668   :  { %1906 = vmatmul.msk.f32.vlgmr.msrb.gmra.mxu3 %vm77_vm1, %v658_v14 }
 0x6a1   :  { %v618_v15 = vpop.xlane.xlu1 %617 }
 0x6a2   :  { %v620_v16 = vsub.f32 %v611_v8, %v618_v15  ;;  %v863_v15 = vld [vmem:[%s2651_s5 + $0x38] sm:$0xff] }
 0x6a3   :  { %880 = vmatpush.msra.mxu2 %v863_v15 }
 0x6a4   :  { %v623_v17 = vmul.f32 1.442695, %v620_v16  ;;  %v862_v16 = vld [vmem:[%s2651_s5 + $0x30] sm:$0xff] }
 0x6a5   :  { %881 = vmatpush.msra.mxu2 %v862_v16 }
 0x6a6   :  { %2014 = vpow2.f32 %v623_v17  ;;  %v549_v23 = vpop.f32.mrf.mxu2  ;;  %v859_v17 = vld [vmem:[%s2651_s5 + $0x18] sm:$0xff] }
 0x6a7   :  { %v555_v26 = vadd.f32 %v549_v23, %v389_v25  ;;  %882 = vmatpush.msra.mxu2 %v861_v34  ;;  %v856_v25 = vld [vmem:[%s2651_s5] sm:$0xff] }
 0x6ac   :  { %v2015_v18 = vpop.eup %2014 }
 0x6ad   :  { %v628_v20 = vsel %vm77_vm1, %v2015_v18, 0.0 }
 0x6ae   :  { %629 = vadd.xlane.f32.xlu1 %v628_v20  ;;  %v858_v20 = vld [vmem:[%s2651_s5 + $0x10] sm:$0xff] }
 0x6e3   :  { %v552_v2 = vpop.f32.mrf.mxu2 }
 0x6e4   :  { %v556_v7 = vadd.f32 %v552_v2, %v392_v3 }
 0x6eb   :  { %v712_v28 = vpop.f32.mrf.mxu3 }
 0x6ec   :  { %v718_v29 = vadd.f32 %v712_v28, %v555_v26 }
 0x6ee   :  { %v721_v31 = vadd.f32 %v720_v27, %v718_v29 }
 0x6f0   :  { %v723_v32 = vadd.f32 %v721_v31, %v2180_v4 }
 0x6f2   :  { %v725_v33 = vsel %vm44_vm0, %v723_v32, 0.0 }
 0x6f3   :  { %726 = vadd.xlane.f32.xlu1 %v725_v33 }
 0x721   :  { %v630_v35 = vpop.xlane.xlu1 %629 }
 0x722   :  { %2016 = vrcp.f32 %v630_v35 }
 0x723   :  { %2018 = vrcp.f32 %v2121_v38 }
 0x728   :  { %v2017_v36 = vpop.eup %2016 }
 0x729   :  { %v634_v37 = vmul.f32 %v2017_v36, %v2015_v18  ;;  %v2019_v30 = vpop.eup %2018  ;;  %v786_v18 = vperm.slane %v2194_v6, 2 }
 0x72a   :  { %v732_v39 = vmul.f32 32.0, %v2019_v30  ;;  %vm736_vm2 = vweird.f32 %v2019_v30 }
 0x72b   :  { %1904 = vmatmul.msk.f32.vlgmr.msrb.gmra.mxu0 %vm77_vm1, %v634_v37 }
 0x72c   :  { %v733_v40 = vsub.f32 1.0, %v732_v39 }
 0x72e   :  { %v734_v41 = vmul.f32 %v2019_v30, %v733_v40 }
 0x730   :  { %v735_v42 = vadd.f32 %v2019_v30, %v734_v41 }
 0x732   :  { %v2332_v43 = vsel %vm736_vm2, %v2019_v30, %v735_v42 }
 0x766   :  { %v727_v4 = vpop.xlane.xlu1 %726 }
 0x767   :  { %v738_v44 = vmul.f32 %v2332_v43, %v727_v4 }
 0x769   :  { %v740_v45 = vsub.f32 %v723_v32, %v738_v44 }
 0x76b   :  { %v742_v46 = vmul.f32 %v740_v45, %v740_v45 }
 0x76d   :  { %v744_v47 = vsel %vm44_vm0, %v742_v46, 0.0 }
 0x76e   :  { %745 = vadd.xlane.f32.xlu0 %v744_v47  ;;  %v864_v47 = vperm.slane %v2194_v6, 3 }
 0x7a8   :  { %v684_v48 = vpop.f32.mrf.mxu0 }
 0x7a9   :  { %1907 = vmatmul.msk.f32.gmra.mxu3 %vm77_vm1, %v684_v48 }
 0x7e1   :  { %v746_v52 = vpop.xlane.xlu0 %745 }
 0x7e2   :  { %v750_v53 = vmul.f32 %v746_v52, %v2332_v43 }
 0x7e4   :  { %v752_v54 = vadd.f32 1e-05, %v750_v53 }
 0x7e6   :  { %2020 = vrsqrt.f32 %v752_v54  ;;  %vm760_vm4 = vweird.f32 %v752_v54 }
 0x7ec   :  { %v2021_v55 = vpop.eup %2020 }
 0x7ed   :  { %v755_v56 = vmul.f32 %v2021_v55, %v752_v54  ;;  %vm761_vm3 = vweird.f32 %v2021_v55 }
 0x7ee   :  { %vm762_vm5 = vmor %vm760_vm4, %vm761_vm3 }
 0x7ef   :  { %v756_v57 = vmul.f32 %v2021_v55, %v755_v56 }
 0x7f1   :  { %v757_v58 = vmul.f32 0.5, %v756_v57 }
 0x7f3   :  { %v758_v59 = vsub.f32 1.5, %v757_v58 }
 0x7f5   :  { %v759_v60 = vmul.f32 %v2021_v55, %v758_v59 }
 0x7f7   :  { %v763_v62 = vsel %vm762_vm5, %v2021_v55, %v759_v60 }
 0x7f8   :  { %v774_v63 = vmul.f32 %v763_v62, %v740_v45 }
 0x7fa   :  { %v777_v0 = vmul.f32 %v776_v61, %v774_v63 }
 0x7fc   :  { %v2356_v1 = vadd.f32 %v779_v11, %v777_v0 }
 0x7fe   :  { %1908 = vmatmul.msk.f32.vlgmr.msrb.gmra.mxu1 %vm44_vm0, %v2356_v1 }
 0x82c   :  { %v715_v8 = vpop.f32.mrf.mxu3 }
 0x82d   :  { %v719_v10 = vadd.f32 %v715_v8, %v556_v7 }
 0x82f   :  { %v722_v12 = vadd.f32 %v720_v27, %v719_v10 }
 0x831   :  { %v724_v13 = vadd.f32 %v722_v12, %v2187_v5  ;;  %v860_v5 = vld [vmem:[%s2651_s5 + $0x20] sm:$0xff] }
 0x832   :  { %883 = vmatpush.msra.mxu2 %v860_v5 }
 0x833   :  { %v728_v14 = vsel %vm44_vm0, %v724_v13, 0.0 }
 0x834   :  { %729 = vadd.xlane.f32.xlu2 %v728_v14  ;;  %884 = vmatpush.msra.mxu2 %v859_v17 }
 0x836   :  { %885 = vmatpush.msra.mxu2 %v858_v20 }
 0x838   :  { %886 = vmatpush.msra.mxu2 %v857_v22 }
 0x83a   :  { %887 = vmatpush.msra.mxu2 %v856_v25 }
 0x87b   :  { %v810_v21 = vpop.f32.mrf.mxu1 }
 0x87c   :  { %v811_v23 = vadd.f32 %v810_v21, %v786_v18 }
 0x87e   :  { %v816_v26 = vsub.f32 0.0, %v811_v23 }
 0x880   :  { %v818_v27 = vmul.f32 1.442695, %v816_v26  ;;  %v1916_v26 = vld [vmem:[%s2648_s2 + $0x38] sm:$0xff] }
 0x881   :  { %973 = vmatpush.msra.mxu0 %v1916_v26 }
 0x882   :  { %2022 = vpow2.f32 %v818_v27  ;;  %v1915_v27 = vld [vmem:[%s2648_s2 + $0x30] sm:$0xff] }
 0x883   :  { %974 = vmatpush.msra.mxu0 %v1915_v27 }
 0x888   :  { %v2023_v28 = vpop.eup %2022 }
 0x889   :  { %v822_v29 = vadd.f32 1.0, %v2023_v28  ;;  %v1914_v28 = vld [vmem:[%s2648_s2 + $0x28] sm:$0xff] }
 0x88a   :  { %975 = vmatpush.msra.mxu0 %v1914_v28 }
 0x88b   :  { %2024 = vrcp.f32 %v822_v29  ;;  %v835_v35 = vand.u32 2147483648, %v822_v29  ;;  %v833_v37 = vand.u32 2147483647, %v822_v29  ;;  %vm829_vm7 = vweird.f32 %v822_v29 }
 0x88d   :  { %v836_v30 = vor.u32 1.1754944e-38, %v835_v35  ;;  %vm834_vm9 = vcmp.eq.f32.partialorder %v833_v37, 8.507059e+37 }
 0x891   :  { %v2025_v31 = vpop.eup %2024 }
 0x892   :  { %v825_v32 = vmul.f32 %v2025_v31, %v822_v29  ;;  %vm830_vm6 = vweird.f32 %v2025_v31  ;;  %v1913_v29 = vld [vmem:[%s2648_s2 + $0x20] sm:$0xff] }
 0x893   :  { %vm831_vm8 = vmor %vm829_vm7, %vm830_vm6  ;;  %976 = vmatpush.msra.mxu0 %v1913_v29 }
 0x894   :  { %v826_v33 = vsub.f32 1.0, %v825_v32 }
 0x896   :  { %v827_v36 = vmul.f32 %v2025_v31, %v826_v33 }
 0x898   :  { %v828_v38 = vadd.f32 %v2025_v31, %v827_v36 }
 0x89a   :  { %v832_v39 = vsel %vm831_vm8, %v2025_v31, %v828_v38 }
 0x89b   :  { %v837_v40 = vsel %vm834_vm9, %v836_v30, %v832_v39 }
 0x89c   :  { %v854_v41 = vmul.f32 %v837_v40, %v811_v23  ;;  %v941_v40 = vperm.slane %v2194_v6, 6 }
 0x89e   :  { %1910 = vmatmul.msk.f32.vlgmr.msra.gmra.mxu2 %vm865_vm10, %v854_v41 }
 0x8a7   :  { %v730_v42 = vpop.xlane.xlu2 %729 }
 0x8a8   :  { %v739_v4 = vmul.f32 %v2332_v43, %v730_v42 }
 0x8aa   :  { %v741_v44 = vsub.f32 %v724_v13, %v739_v4  ;;  %v944_v4 = vperm.slane %v2194_v6, 7 }
 0x8ac   :  { %v743_v45 = vmul.f32 %v741_v44, %v741_v44 }
 0x8ae   :  { %v747_v46 = vsel %vm44_vm0, %v743_v45, 0.0 }
 0x8af   :  { %748 = vadd.xlane.f32.xlu1 %v747_v46 }
 0x921   :  { %v889_v48 = vpop.f32.mrf.mxu2 }
 0x922   :  { %v890_v49 = vadd.f32 %v889_v48, %v864_v47  ;;  %v749_v9 = vpop.xlane.xlu1 %748 }
 0x923   :  { %v751_v50 = vmul.f32 %v749_v9, %v2332_v43 }
 0x924   :  { %v895_v51 = vadd.f32 %v890_v49, %v2356_v1 }
 0x925   :  { %v753_v52 = vadd.f32 1e-05, %v751_v50  ;;  %v2434_v50 = vld [vmem:[%s2652_s6 + $0x8] sm:$0xff] }
 0x926   :  { %v897_v53 = vsel %vm44_vm0, %v895_v51, 0.0 }
 0x927   :  { %2026 = vrsqrt.f32 %v753_v52  ;;  %898 = vadd.xlane.f32.xlu1 %v897_v53  ;;  %vm770_vm12 = vweird.f32 %v753_v52 }
 0x92d   :  { %v2027_v54 = vpop.eup %2026 }
 0x92e   :  { %v765_v55 = vmul.f32 %v2027_v54, %v753_v52  ;;  %vm771_vm11 = vweird.f32 %v2027_v54 }
 0x92f   :  { %vm772_vm13 = vmor %vm770_vm12, %vm771_vm11 }
 0x930   :  { %v766_v56 = vmul.f32 %v2027_v54, %v765_v55 }
 0x932   :  { %v767_v57 = vmul.f32 0.5, %v766_v56 }
 0x934   :  { %v768_v58 = vsub.f32 1.5, %v767_v57 }
 0x936   :  { %v769_v59 = vmul.f32 %v2027_v54, %v768_v58 }
 0x938   :  { %v773_v60 = vsel %vm772_vm13, %v2027_v54, %v769_v59 }
 0x939   :  { %v775_v62 = vmul.f32 %v773_v60, %v741_v44 }
 0x93b   :  { %v778_v63 = vmul.f32 %v776_v61, %v775_v62 }
 0x93d   :  { %v781_v0 = vadd.f32 %v779_v11, %v778_v63 }
 0x93f   :  { %1909 = vmatmul.msk.f32.gmra.mxu1 %vm44_vm0, %v781_v0 }
 0x99a   :  { %v899_v1 = vpop.xlane.xlu1 %898 }
 0x99b   :  { %v903_v2 = vmul.f32 %v899_v1, %v2332_v43 }
 0x99d   :  { %v905_v3 = vsub.f32 %v895_v51, %v903_v2  ;;  %v954_v51 = vperm.slane %v2434_v50, 0 }
 0x99f   :  { %v907_v7 = vmul.f32 %v905_v3, %v905_v3 }
 0x9a1   :  { %v909_v8 = vsel %vm44_vm0, %v907_v7, 0.0 }
 0x9a2   :  { %910 = vadd.xlane.f32.xlu1 %v909_v8 }
 0x9bc   :  { %v813_v10 = vpop.f32.mrf.mxu1 }
 0x9bd   :  { %v814_v12 = vadd.f32 %v813_v10, %v786_v18 }
 0x9bf   :  { %v817_v13 = vsub.f32 0.0, %v814_v12 }
 0x9c1   :  { %v820_v14 = vmul.f32 1.442695, %v817_v13 }
 0x9c3   :  { %2028 = vpow2.f32 %v820_v14 }
 0x9c9   :  { %v2029_v61 = vpop.eup %2028 }
 0x9ca   :  { %v823_v15 = vadd.f32 1.0, %v2029_v61 }
 0x9cc   :  { %2030 = vrcp.f32 %v823_v15  ;;  %v850_v5 = vand.u32 2147483648, %v823_v15  ;;  %v848_v20 = vand.u32 2147483647, %v823_v15  ;;  %vm844_vm15 = vweird.f32 %v823_v15 }
 0x9ce   :  { %v851_v22 = vor.u32 1.1754944e-38, %v850_v5  ;;  %vm849_vm3 = vcmp.eq.f32.partialorder %v848_v20, 8.507059e+37 }
 0x9d2   :  { %v2031_v11 = vpop.eup %2030 }
 0x9d3   :  { %v840_v16 = vmul.f32 %v2031_v11, %v823_v15  ;;  %vm845_vm14 = vweird.f32 %v2031_v11 }
 0x9d4   :  { %vm846_vm2 = vmor %vm844_vm15, %vm845_vm14 }
 0x9d5   :  { %v841_v34 = vsub.f32 1.0, %v840_v16 }
 0x9d7   :  { %v842_v17 = vmul.f32 %v2031_v11, %v841_v34 }
 0x9d9   :  { %v843_v21 = vadd.f32 %v2031_v11, %v842_v17 }
 0x9db   :  { %v847_v23 = vsel %vm846_vm2, %v2031_v11, %v843_v21 }
 0x9dc   :  { %v852_v18 = vsel %vm849_vm3, %v851_v22, %v847_v23 }
 0x9dd   :  { %v855_v25 = vmul.f32 %v852_v18, %v814_v12 }
 0x9df   :  { %1911 = vmatmul.msk.f32.gmra.mxu2 %vm865_vm10, %v855_v25 }
 0xa15   :  { %v911_v31 = vpop.xlane.xlu1 %910 }
 0xa16   :  { %v915_v32 = vmul.f32 %v911_v31, %v2332_v43 }
 0xa18   :  { %v917_v33 = vadd.f32 1e-05, %v915_v32 }
 0xa1a   :  { %2032 = vrsqrt.f32 %v917_v33  ;;  %vm925_vm5 = vweird.f32 %v917_v33 }
 0xa20   :  { %v2033_v35 = vpop.eup %2032 }
 0xa21   :  { %v920_v36 = vmul.f32 %v2033_v35, %v917_v33  ;;  %vm926_vm4 = vweird.f32 %v2033_v35 }
 0xa22   :  { %vm927_vm6 = vmor %vm925_vm5, %vm926_vm4 }
 0xa23   :  { %v921_v37 = vmul.f32 %v2033_v35, %v920_v36 }
 0xa25   :  { %v922_v38 = vmul.f32 0.5, %v921_v37 }
 0xa27   :  { %v923_v30 = vsub.f32 1.5, %v922_v38 }
 0xa29   :  { %v924_v39 = vmul.f32 %v2033_v35, %v923_v30 }
 0xa2b   :  { %v928_v41 = vsel %vm927_vm6, %v2033_v35, %v924_v39 }
 0xa2c   :  { %v939_v42 = vmul.f32 %v928_v41, %v905_v3 }
 0xa2e   :  { %v942_v44 = vmul.f32 %v941_v40, %v939_v42 }
 0xa30   :  { %v2424_v45 = vadd.f32 %v944_v4, %v942_v44  ;;  %v1925_v44 = vld [vmem:[%s2649_s3 + $0x20] sm:$0xff] }
 0xa32   :  { %1917 = vmatmul.msk.f32.vlgmr.msra.gmra.mxu0 %vm44_vm0, %v2424_v45 }
 0xa62   :  { %v892_v46 = vpop.f32.mrf.mxu2 }
 0xa63   :  { %v893_v48 = vadd.f32 %v892_v46, %v864_v47 }
 0xa65   :  { %v896_v49 = vadd.f32 %v893_v48, %v781_v0 }
 0xa67   :  { %v900_v9 = vsel %vm44_vm0, %v896_v49, 0.0 }
 0xa68   :  { %901 = vadd.xlane.f32.xlu1 %v900_v9 }
 0xaaf   :  { %v978_v52 = vpop.f32.mrf.mxu0 }
 0xab0   :  { %v2437_v53 = vadd.f32 %v978_v52, %v954_v51 }
 0xab2   :  { %1116 = vrot.lane.b32.xlu0 %v2437_v53, %s2112_s0  ;;  %985 = vrot.lane.b32.xlu2 %v2437_v53, %s2111_s16 }
 0xadb   :  { %v902_v6 = vpop.xlane.xlu1 %901 }
 0xadc   :  { %v904_v47 = vmul.f32 %v902_v6, %v2332_v43 }
 0xade   :  { %v906_v54 = vsub.f32 %v896_v49, %v904_v47 }
 0xae0   :  { %v908_v55 = vmul.f32 %v906_v54, %v906_v54 }
 0xae2   :  { %v912_v56 = vsel %vm44_vm0, %v908_v55, 0.0 }
 0xae3   :  { %913 = vadd.xlane.f32.xlu1 %v912_v56 }
 0xafc   :  { %1114 = vrot.lane.b32.xlu1 %v2437_v53, %s2113_s17 }
 0xb0c   :  { %v986_v57 = vpop.permute.xlu2 %985 }
 0xb0d   :  { %1919 = vmatpush.xpose.msk.msra.mxu3 %vm77_vm1, %v986_v57 }
 0xb10   :  { %1920 = vmatmul.msk.f32.vlgmr.msra.gmra.mxu3 %vm77_vm1, %v2437_v53 }
 0xb24   :  { %v1117_v58 = vpop.permute.xlu0 %1116 }
 0xb25   :  { %1926 = vmatpush.xpose.msk.msrb.mxu3 %vm77_vm1, %v1117_v58 }
 0xb56   :  { %v914_v59 = vpop.xlane.xlu1 %913 }
 0xb57   :  { %v916_v60 = vmul.f32 %v914_v59, %v2332_v43 }
 0xb59   :  { %v918_v62 = vadd.f32 1e-05, %v916_v60  ;;  %v1932_v60 = vld [vmem:[%s2649_s3 + $0x28] sm:$0xff] }
 0xb5a   :  { %1267 = vmatpush.msra.mxu3 %v1932_v60 }
 0xb5b   :  { %2034 = vrsqrt.f32 %v918_v62  ;;  %vm935_vm8 = vweird.f32 %v918_v62 }
 0xb61   :  { %v2035_v63 = vpop.eup %2034 }
 0xb62   :  { %v930_v0 = vmul.f32 %v2035_v63, %v918_v62  ;;  %vm936_vm7 = vweird.f32 %v2035_v63 }
 0xb63   :  { %vm937_vm9 = vmor %vm935_vm8, %vm936_vm7 }
 0xb64   :  { %v931_v1 = vmul.f32 %v2035_v63, %v930_v0 }
 0xb66   :  { %v932_v2 = vmul.f32 0.5, %v931_v1 }
 0xb68   :  { %v933_v3 = vsub.f32 1.5, %v932_v2 }
 0xb6a   :  { %v934_v7 = vmul.f32 %v2035_v63, %v933_v3 }
 0xb6c   :  { %v938_v8 = vsel %vm937_vm9, %v2035_v63, %v934_v7 }
 0xb6d   :  { %v940_v10 = vmul.f32 %v938_v8, %v906_v54 }
 0xb6e   :  { %v1115_v12 = vpop.permute.xlu1 %1114 }
 0xb6f   :  { %1927 = vmatmul.msk.f32.vlgmr.msrb.gmra.mxu3 %vm77_vm1, %v1115_v12  ;;  %v943_v13 = vmul.f32 %v941_v40, %v940_v10 }
 0xb71   :  { %v2453_v14 = vadd.f32 %v944_v4, %v943_v13 }
 0xb73   :  { %1918 = vmatmul.msk.f32.gmra.mxu0 %vm44_vm0, %v2453_v14 }
 0xb93   :  { %v1008_v61 = vpop.f32.mrf.mxu3 }
 0xb94   :  { %v1009_v15 = vadd.f32 %v1008_v61, %v2225_v19 }
 0xb96   :  { %v1038_v11 = vsel %vm77_vm1, %v1009_v15, -inf }
 0xb97   :  { %1039 = vmax.xlane.f32.xlu2 %v1038_v11 }
 0xbf0   :  { %v981_v16 = vpop.f32.mrf.mxu0 }
 0xbf1   :  { %v2459_v34 = vadd.f32 %v981_v16, %v954_v51 }
 0xbf2   :  { %v1139_v22 = vpop.f32.mrf.mxu3 }
 0xbf3   :  { %1144 = vrot.lane.b32.xlu2 %v2459_v34, %s2112_s0  ;;  %1012 = vrot.lane.b32.xlu0 %v2459_v34, %s2111_s16  ;;  %v1140_v18 = vadd.f32 %v1139_v22, %v2225_v19 }
 0xbf5   :  { %v1170_v25 = vsel %vm77_vm1, %v1140_v18, -inf }
 0xc0a   :  { %v1040_v5 = vpop.xlane.xlu2 %1039 }
 0xc0b   :  { %v1044_v17 = vsub.f32 %v1009_v15, %v1040_v5 }
 0xc0d   :  { %v1046_v20 = vmul.f32 1.442695, %v1044_v17 }
 0xc0f   :  { %2036 = vpow2.f32 %v1046_v20 }
 0xc15   :  { %v2037_v21 = vpop.eup %2036 }
 0xc16   :  { %v1050_v23 = vsel %vm77_vm1, %v2037_v21, 0.0 }
 0xc17   :  { %1051 = vadd.xlane.f32.xlu1 %v1050_v23 }
 0xc1d   :  { %1171 = vmax.xlane.f32.xlu0 %v1170_v25 }
 0xc30   :  { %1192 = vrot.lane.b32.xlu1 %v2437_v53, %s2115_s20 }
 0xc31   :  { %1060 = vrot.lane.b32.xlu0 %v2437_v53, %s2110_s15 }
 0xc38   :  { %1306 = vrot.lane.b32.xlu1 %v2437_v53, %s2116_s21 }
 0xc39   :  { %1142 = vrot.lane.b32.xlu0 %v2459_v34, %s2113_s17 }
 0xc4d   :  { %v1145_v27 = vpop.permute.xlu2 %1144 }
 0xc65   :  { %v1013_v26 = vpop.permute.xlu0 %1012 }
 0xc66   :  { %1921 = vmatpush.xpose.msk.msra.mxu1 %vm77_vm1, %v1013_v26 }
 0xc69   :  { %1922 = vmatmul.msk.f32.vlgmr.msra.gmra.mxu1 %vm77_vm1, %v2459_v34 }
 0xc6a   :  { %1928 = vmatpush.xpose.msk.msrb.mxu1 %vm77_vm1, %v1145_v27 }
 0xc6e   :  { %1296 = vmatpush.msra.mxu1 %v1925_v44 }
 0xc8a   :  { %v1052_v32 = vpop.xlane.xlu1 %1051 }
 0xc90   :  { %v1172_v28 = vpop.xlane.xlu0 %1171 }
 0xc91   :  { %v1176_v29 = vsub.f32 %v1140_v18, %v1172_v28 }
 0xc93   :  { %v1178_v31 = vmul.f32 1.442695, %v1176_v29 }
 0xc95   :  { %2038 = vpow2.f32 %v1178_v31 }
 0xc96   :  { %2040 = vrcp.f32 %v1052_v32 }
 0xc9b   :  { %v2039_v33 = vpop.eup %2038 }
 0xc9c   :  { %v1182_v35 = vsel %vm77_vm1, %v2039_v33, 0.0  ;;  %v2041_v36 = vpop.eup %2040 }
 0xc9d   :  { %1183 = vadd.xlane.f32.xlu2 %v1182_v35  ;;  %v1058_v38 = vmul.f32 %v2041_v36, %v2037_v21 }
 0xca2   :  { %v1193_v37 = vpop.permute.xlu1 %1192 }
 0xca3   :  { %v1061_v30 = vpop.permute.xlu0 %1060 }
 0xca4   :  { %1081 = vmatpush.msrb.mxu2 %v1061_v30 }
 0xca5   :  { %1923 = vmatmul.msk.f32.vlgmr.msrb.gmra.mxu2 %vm77_vm1, %v1058_v38 }
 0xca6   :  { %1213 = vmatpush.msra.mxu2 %v1193_v37 }
 0xcaa   :  { %v1307_v39 = vpop.permute.xlu1 %1306 }
 0xcab   :  { %v1143_v40 = vpop.permute.xlu0 %1142  ;;  %1937 = vmatpush.xpose.msk.msrb.mxu2 %vm77_vm1, %v1307_v39 }
 0xcac   :  { %1929 = vmatmul.msk.f32.vlgmr.msrb.gmra.mxu1 %vm77_vm1, %v1143_v40 }
 0xcb5   :  { %1304 = vrot.lane.b32.xlu2 %v2437_v53, %s2114_s1 }
 0xcbd   :  { %1086 = vrot.lane.b32.xlu2 %v2459_v34, %s2110_s15 }
 0xce6   :  { %v1035_v41 = vpop.f32.mrf.mxu1 }
 0xce7   :  { %v1036_v42 = vadd.f32 %v1035_v41, %v2229_v24 }
 0xce9   :  { %v1041_v4 = vsel %vm77_vm1, %v1036_v42, -inf }
 0xcea   :  { %1042 = vmax.xlane.f32.xlu0 %v1041_v4 }
 0xd10   :  { %v1184_v46 = vpop.xlane.xlu2 %1183 }
 0xd11   :  { %2042 = vrcp.f32 %v1184_v46  ;;  %v1943_v46 = vld [vmem:[%s2649_s3 + $0x30] sm:$0xff] }
 0xd12   :  { %1457 = vmatpush.msrb.mxu3 %v1943_v46 }
 0xd17   :  { %v2043_v48 = vpop.eup %2042 }
 0xd18   :  { %v1190_v49 = vmul.f32 %v2043_v48, %v2039_v33  ;;  %v1305_v9 = vpop.permute.xlu2 %1304 }
 0xd1a   :  { %1930 = vmatmul.msk.f32.vlgmr.msra.gmra.mxu2 %vm77_vm1, %v1190_v49 }
 0xd20   :  { %v1087_v51 = vpop.permute.xlu2 %1086 }
 0xd21   :  { %1107 = vmatpush.msrb.mxu0 %v1087_v51 }
 0xd22   :  { %1938 = vmatmul.msk.f32.vlgmr.msrb.gmra.mxu2 %vm77_vm1, %v1305_v9 }
 0xd28   :  { %v1083_v52 = vpop.f32.mrf.mxu2 }
 0xd29   :  { %v1167_v6 = vpop.f32.mrf.mxu1  ;;  %1935 = vmatmul.msk.f32.vlgmr.msra.gmra.mxu1 %vm77_vm1, %v1083_v52 }
 0xd2a   :  { %v1168_v47 = vadd.f32 %v1167_v6, %v2229_v24 }
 0xd2c   :  { %v1173_v54 = vsel %vm77_vm1, %v1168_v47, -inf }
 0xd2d   :  { %1174 = vmax.xlane.f32.xlu2 %v1173_v54 }
 0xd45   :  { %1332 = vrot.lane.b32.xlu2 %v2459_v34, %s2114_s1 }
 0xd5d   :  { %v1043_v55 = vpop.xlane.xlu0 %1042 }
 0xd5e   :  { %v1045_v56 = vsub.f32 %v1036_v42, %v1043_v55 }
 0xd60   :  { %v1048_v57 = vmul.f32 1.442695, %v1045_v56 }
 0xd62   :  { %2044 = vpow2.f32 %v1048_v57 }
 0xd68   :  { %v2045_v58 = vpop.eup %2044 }
 0xd69   :  { %v1053_v59 = vsel %vm77_vm1, %v2045_v58, 0.0 }
 0xd6a   :  { %1054 = vadd.xlane.f32.xlu1 %v1053_v59 }
 0xd83   :  { %1334 = vrot.lane.b32.xlu1 %v2459_v34, %s2116_s21  ;;  %s2123_s21 = smov 128  }
 0xd9d   :  { %v1215_v62 = vpop.f32.mrf.mxu2 }
 0xd9e   :  { %1933 = vmatmul.msk.f32.vlgmr.msra.gmra.mxu3 %vm77_vm1, %v1215_v62 }
 0xda0   :  { %v1175_v63 = vpop.xlane.xlu2 %1174 }
 0xda1   :  { %v1177_v0 = vsub.f32 %v1168_v47, %v1175_v63 }
 0xda3   :  { %v1180_v1 = vmul.f32 1.442695, %v1177_v0 }
 0xda5   :  { %2046 = vpow2.f32 %v1180_v1  ;;  %v1329_v2 = vpop.f32.mrf.mxu2 }
 0xda6   :  { %v1330_v3 = vadd.f32 %v1329_v2, %v2225_v19  ;;  %v2536_v40 = vpop.f32.mrf.mxu1 }
 0xda8   :  { %v1360_v7 = vsel %vm77_vm1, %v1330_v3, -inf  ;;  %v1333_v26 = vpop.permute.xlu2 %1332 }
 0xda9   :  { %1361 = vmax.xlane.f32.xlu0 %v1360_v7 }
 0xdab   :  { %v2047_v8 = vpop.eup %2046 }
 0xdac   :  { %v1185_v10 = vsel %vm77_vm1, %v2047_v8, 0.0 }
 0xdad   :  { %1186 = vadd.xlane.f32.xlu1 %v1185_v10 }
 0xdbd   :  { %1218 = vrot.lane.b32.xlu0 %v2459_v34, %s2115_s20  ;;  %s1859_s20 = sshll.u32 %s2653_s7, 4  ;;  %s1860_s20 = int_to_ptr.hbm [resolvable:$true] %s1859_s20 }
 0xdc5   :  { %1382 = vrot.lane.b32.xlu0 %v2437_v53, %s2119_s28 }
 0xdc6   :  { %1497 = vrot.lane.b32.xlu1 %v2459_v34, %s2118_s25 }
 0xdcd   :  { %1469 = vrot.lane.b32.xlu0 %v2437_v53, %s2118_s25 }
 0xdd5   :  { %1467 = vrot.lane.b32.xlu0 %v2437_v53, %s2117_s22 }
 0xddd   :  { %v1055_v12 = vpop.xlane.xlu1 %1054 }
 0xdde   :  { %2048 = vrcp.f32 %v1055_v12 }
 0xde4   :  { %v2049_v13 = vpop.eup %2048 }
 0xde5   :  { %v1059_v61 = vmul.f32 %v2049_v13, %v2045_v58 }
 0xde7   :  { %1924 = vmatmul.msk.f32.vlgmr.msrb.gmra.mxu0 %vm77_vm1, %v1059_v61 }
 0xdf5   :  { %v1335_v15 = vpop.permute.xlu1 %1334 }
 0xe1c   :  { %v1362_v11 = vpop.xlane.xlu0 %1361 }
 0xe1d   :  { %v1366_v16 = vsub.f32 %v1330_v3, %v1362_v11 }
 0xe1f   :  { %v1368_v5 = vmul.f32 1.442695, %v1366_v16 }
 0xe20   :  { %v1187_v17 = vpop.xlane.xlu1 %1186 }
 0xe21   :  { %2050 = vpow2.f32 %v1368_v5 }
 0xe22   :  { %2052 = vrcp.f32 %v1187_v17 }
 0xe27   :  { %v2051_v20 = vpop.eup %2050 }
 0xe28   :  { %v1372_v21 = vsel %vm77_vm1, %v2051_v20, 0.0  ;;  %v2053_v22 = vpop.eup %2052 }
 0xe29   :  { %1373 = vadd.xlane.f32.xlu2 %v1372_v21  ;;  %v1191_v23 = vmul.f32 %v2053_v22, %v2047_v8 }
 0xe2f   :  { %v1219_v18 = vpop.permute.xlu0 %1218 }
 0xe30   :  { %1239 = vmatpush.msra.mxu0 %v1219_v18 }
 0xe31   :  { %1931 = vmatmul.msk.f32.vlgmr.msra.gmra.mxu0 %vm77_vm1, %v1191_v23 }
 0xe32   :  { %1939 = vmatpush.xpose.msk.msrb.mxu0 %vm77_vm1, %v1335_v15 }
 0xe37   :  { %v1383_v25 = vpop.permute.xlu0 %1382 }
 0xe38   :  { %1403 = vmatpush.msra.mxu2 %v1383_v25  ;;  %v1498_v27 = vpop.permute.xlu1 %1497  ;;  %v1630_v25 = vperm.slane %v2434_v50, 1 }
 0xe39   :  { %1940 = vmatmul.msk.f32.vlgmr.msrb.gmra.mxu0 %vm77_vm1, %v1333_v26 }
 0xe3a   :  { %1948 = vmatpush.xpose.msk.msrb.mxu2 %vm77_vm1, %v1498_v27 }
 0xe3f   :  { %v1470_v28 = vpop.permute.xlu0 %1469 }
 0xe40   :  { %1946 = vmatpush.xpose.msk.msrb.mxu1 %vm77_vm1, %v1470_v28 }
 0xe41   :  { %1495 = vrot.lane.b32.xlu2 %v2459_v34, %s2117_s22 }
 0xe47   :  { %v1468_v31 = vpop.permute.xlu0 %1467 }
 0xe64   :  { %v1109_v29 = vpop.f32.mrf.mxu0 }
 0xe65   :  { %1936 = vmatmul.msk.f32.gmra.mxu1 %vm77_vm1, %v1109_v29 }
 0xe6d   :  { %1947 = vmatmul.msk.f32.vlgmr.msrb.gmra.mxu1 %vm77_vm1, %v1468_v31 }
 0xe9c   :  { %v1374_v32 = vpop.xlane.xlu2 %1373 }
 0xe9d   :  { %2054 = vrcp.f32 %v1374_v32 }
 0xea3   :  { %v2055_v33 = vpop.eup %2054 }
 0xea4   :  { %v1380_v35 = vmul.f32 %v2055_v33, %v2051_v20  ;;  %v1496_v36 = vpop.permute.xlu2 %1495  ;;  %v1269_v20 = vpop.f32.mrf.mxu3 }
 0xea5   :  { %v1299_v23 = vadd.f32 %v2536_v40, %v1269_v20  ;;  %v1967_v20 = vld [vmem:[%s2651_s5 + $0x70] sm:$0xff] }
 0xea6   :  { %1941 = vmatmul.msk.f32.vlgmr.msra.gmra.mxu2 %vm77_vm1, %v1380_v35 }
 0xeae   :  { %v1241_v37 = vpop.f32.mrf.mxu0  ;;  %1949 = vmatmul.msk.f32.vlgmr.msrb.gmra.mxu2 %vm77_vm1, %v1496_v36 }
 0xeaf   :  { %1934 = vmatmul.msk.f32.gmra.mxu3 %vm77_vm1, %v1241_v37 }
 0xeb6   :  { %v1357_v38 = vpop.f32.mrf.mxu0 }
 0xeb7   :  { %v1358_v30 = vadd.f32 %v1357_v38, %v2229_v24 }
 0xeb9   :  { %v1363_v39 = vsel %vm77_vm1, %v1358_v30, -inf }
 0xeba   :  { %1364 = vmax.xlane.f32.xlu1 %v1363_v39 }
 0xee2   :  { %v2538_v41 = vpop.f32.mrf.mxu1 }
 0xeea   :  { %v1492_v42 = vpop.f32.mrf.mxu1 }
 0xeeb   :  { %v1493_v4 = vadd.f32 %v1492_v42, %v2225_v19 }
 0xeed   :  { %v1523_v44 = vsel %vm77_vm1, %v1493_v4, -inf }
 0xeee   :  { %1524 = vmax.xlane.f32.xlu0 %v1523_v44 }
 0xf29   :  { %v1405_v48 = vpop.f32.mrf.mxu2 }
 0xf2a   :  { %1944 = vmatmul.msk.f32.vlgmr.msrb.gmra.mxu3 %vm77_vm1, %v1405_v48 }
 0xf2d   :  { %v1365_v49 = vpop.xlane.xlu1 %1364 }
 0xf2e   :  { %v1367_v9 = vsub.f32 %v1358_v30, %v1365_v49 }
 0xf30   :  { %v1370_v51 = vmul.f32 1.442695, %v1367_v9 }
 0xf31   :  { %v1520_v52 = vpop.f32.mrf.mxu2 }
 0xf32   :  { %2056 = vpow2.f32 %v1370_v51  ;;  %v1521_v6 = vadd.f32 %v1520_v52, %v2229_v24  ;;  %v1272_v21 = vpop.f32.mrf.mxu3  ;;  %v1957_v51 = vld [vmem:[%s2650_s4 + $0x30] sm:$0xff]  ;;  %v1956_v52 = vld [vmem:[%s2650_s4 + $0x28] sm:$0xff] }
 0xf33   :  { %v1302_v33 = vadd.f32 %v2538_v41, %v1272_v21  ;;  %v1966_v21 = vld [vmem:[%s2651_s5 + $0x68] sm:$0xff] }
 0xf34   :  { %v1526_v19 = vsel %vm77_vm1, %v1521_v6, -inf }
 0xf35   :  { %1527 = vmax.xlane.f32.xlu2 %v1526_v19 }
 0xf38   :  { %v2057_v47 = vpop.eup %2056 }
 0xf39   :  { %v1375_v54 = vsel %vm77_vm1, %v2057_v47, 0.0 }
 0xf3a   :  { %1376 = vadd.xlane.f32.xlu1 %v1375_v54 }
 0xf4d   :  { %1408 = vrot.lane.b32.xlu2 %v2459_v34, %s2119_s28 }
 0xf61   :  { %v1525_v55 = vpop.xlane.xlu0 %1524 }
 0xf62   :  { %v1529_v56 = vsub.f32 %v1493_v4, %v1525_v55 }
 0xf64   :  { %v1531_v57 = vmul.f32 1.442695, %v1529_v56 }
 0xf66   :  { %2058 = vpow2.f32 %v1531_v57 }
 0xf6c   :  { %v2059_v58 = vpop.eup %2058 }
 0xf6d   :  { %v1535_v59 = vsel %vm77_vm1, %v2059_v58, 0.0 }
 0xf6e   :  { %1536 = vadd.xlane.f32.xlu0 %v1535_v59 }
 0xf82   :  { %1545 = vrot.lane.b32.xlu0 %v2437_v53, %s2120_s29 }
 0xfa8   :  { %v1528_v24 = vpop.xlane.xlu2 %1527 }
 0xfa9   :  { %v1530_v60 = vsub.f32 %v1521_v6, %v1528_v24  ;;  %v1955_v6 = vld [vmem:[%s2650_s4 + $0x20] sm:$0xff] }
 0xfab   :  { %v1533_v62 = vmul.f32 1.442695, %v1530_v60  ;;  %v1679_v60 = vperm.slane %v2434_v50, 4 }
 0xfad   :  { %2060 = vpow2.f32 %v1533_v62  ;;  %v1377_v63 = vpop.xlane.xlu1 %1376  ;;  %v1459_v22 = vpop.f32.mrf.mxu3 }
 0xfae   :  { %2062 = vrcp.f32 %v1377_v63  ;;  %v1465_v18 = vadd.f32 %v1459_v22, %v1299_v23  ;;  %v1965_v22 = vld [vmem:[%s2651_s5 + $0x60] sm:$0xff]  ;;  %v1964_v23 = vld [vmem:[%s2651_s5 + $0x58] sm:$0xff] }
 0xfb0   :  { %v1409_v0 = vpop.permute.xlu2 %1408 }
 0xfb1   :  { %1429 = vmatpush.msra.mxu0 %v1409_v0  ;;  %v1682_v0 = vperm.slane %v2434_v50, 5 }
 0xfb3   :  { %v2061_v1 = vpop.eup %2060 }
 0xfb4   :  { %v2063_v2 = vpop.eup %2062  ;;  %v1538_v3 = vsel %vm77_vm1, %v2061_v1, 0.0 }
 0xfb5   :  { %v1381_v7 = vmul.f32 %v2063_v2, %v2057_v47  ;;  %1539 = vadd.xlane.f32.xlu1 %v1538_v3 }
 0xfb7   :  { %1942 = vmatmul.msk.f32.vlgmr.msra.gmra.mxu0 %vm77_vm1, %v1381_v7 }
 0xfce   :  { %1571 = vrot.lane.b32.xlu1 %v2459_v34, %s2120_s29  ;;  %v1952_v34 = vld [vmem:[%s2649_s3 + $0x38] sm:$0xff]  ;;  %s2124_s3 = smov 8  }
 0xfcf   :  { %1620 = vmatpush.msra.mxu2 %v1952_v34 }
 0xfe1   :  { %v1537_v53 = vpop.xlane.xlu0 %1536 }
 0xfe2   :  { %2064 = vrcp.f32 %v1537_v53 }
 0xfe8   :  { %v2065_v8 = vpop.eup %2064 }
 0xfe9   :  { %v1543_v10 = vmul.f32 %v2065_v8, %v2059_v58 }
 0xff4   :  { %v1546_v12 = vpop.permute.xlu0 %1545 }
 0xff5   :  { %1566 = vmatpush.msrb.mxu0 %v1546_v12 }
 0xff6   :  { %1950 = vmatmul.msk.f32.vlgmr.msrb.gmra.mxu0 %vm77_vm1, %v1543_v10 }
0x1028   :  { %v1540_v13 = vpop.xlane.xlu1 %1539 }
0x1029   :  { %2066 = vrcp.f32 %v1540_v13 }
0x102f   :  { %v2067_v15 = vpop.eup %2066 }
0x1030   :  { %v1544_v11 = vmul.f32 %v2067_v15, %v2061_v1 }
0x1034   :  { %v1431_v61 = vpop.f32.mrf.mxu0 }
0x1035   :  { %1945 = vmatmul.msk.f32.gmra.mxu3 %vm77_vm1, %v1431_v61 }
0x1040   :  { %v1572_v16 = vpop.permute.xlu1 %1571 }
0x1041   :  { %1592 = vmatpush.msra.mxu1 %v1572_v16 }
0x1042   :  { %1951 = vmatmul.msk.f32.vlgmr.msra.gmra.mxu1 %vm77_vm1, %v1544_v11 }
0x1073   :  { %v1568_v5 = vpop.f32.mrf.mxu0 }
0x1074   :  { %1953 = vmatmul.msk.f32.vlgmr.msra.gmra.mxu2 %vm77_vm1, %v1568_v5 }
0x10b8   :  { %v1462_v32 = vpop.f32.mrf.mxu3 }
0x10b9   :  { %v1466_v35 = vadd.f32 %v1462_v32, %v1302_v33 }
0x10bf   :  { %v1594_v17 = vpop.f32.mrf.mxu1 }
0x10c0   :  { %1954 = vmatmul.msk.f32.gmra.mxu2 %vm77_vm1, %v1594_v17  ;;  %v1968_v17 = vld [vmem:[%s2651_s5 + $0x78] sm:$0xff] }
0x10c1   :  { %1784 = vmatpush.msra.mxu3 %v1968_v17 }
0x10c3   :  { %1785 = vmatpush.msra.mxu3 %v1967_v20 }
0x10c5   :  { %1786 = vmatpush.msra.mxu3 %v1966_v21 }
0x10c7   :  { %1787 = vmatpush.msra.mxu3 %v1965_v22 }
0x10c9   :  { %1788 = vmatpush.msra.mxu3 %v1964_v23 }
0x10f7   :  { %v1622_v26 = vpop.f32.mrf.mxu2 }
0x10f8   :  { %v1628_v27 = vadd.f32 %v1622_v26, %v1465_v18  ;;  %v1690_v18 = vperm.slane %v2434_v50, 2 }
0x10fa   :  { %v1631_v28 = vadd.f32 %v1630_v25, %v1628_v27  ;;  %v1962_v27 = vld [vmem:[%s2651_s5 + $0x48] sm:$0xff] }
0x10fc   :  { %v1633_v29 = vadd.f32 %v1631_v28, %v2424_v45 }
0x10fe   :  { %v1635_v31 = vsel %vm44_vm0, %v1633_v29, 0.0 }
0x10ff   :  { %1636 = vadd.xlane.f32.xlu2 %v1635_v31 }
0x1143   :  { %v1625_v36 = vpop.f32.mrf.mxu2 }
0x1144   :  { %v1629_v37 = vadd.f32 %v1625_v36, %v1466_v35 }
0x1146   :  { %v1632_v38 = vadd.f32 %v1630_v25, %v1629_v37  ;;  %v1963_v25 = vld [vmem:[%s2651_s5 + $0x50] sm:$0xff] }
0x1147   :  { %1789 = vmatpush.msra.mxu3 %v1963_v25 }
0x1148   :  { %v1634_v30 = vadd.f32 %v1632_v38, %v2453_v14  ;;  %v1958_v14 = vld [vmem:[%s2650_s4 + $0x38] sm:$0xff] }
0x1149   :  { %1709 = vmatpush.msra.mxu0 %v1958_v14  ;;  %1790 = vmatpush.msra.mxu3 %v1962_v27 }
0x114a   :  { %v1638_v39 = vsel %vm44_vm0, %v1634_v30, 0.0 }
0x114b   :  { %1639 = vadd.xlane.f32.xlu0 %v1638_v39  ;;  %1710 = vmatpush.msra.mxu0 %v1957_v51 }
0x114d   :  { %1711 = vmatpush.msra.mxu0 %v1956_v52 }
0x114f   :  { %1712 = vmatpush.msra.mxu0 %v1955_v6 }
0x1172   :  { %v1637_v40 = vpop.xlane.xlu2 %1636 }
0x1173   :  { %v1641_v42 = vmul.f32 %v1637_v40, %v2332_v43 }
0x1175   :  { %v1643_v4 = vsub.f32 %v1633_v29, %v1641_v42  ;;  %v1961_v29 = vld [vmem:[%s2651_s5 + $0x40] sm:$0xff]  ;;  %s2122_s5 = smov [#allocation2]  }
0x1176   :  { %1791 = vmatpush.msra.mxu3 %v1961_v29  ;;  %s1857_s0 = sshll.u32 %s2122_s5, 4  ;;  %s1858_s0 = int_to_ptr.vmem [resolvable:$true] %s1857_s0 }
0x1177   :  { %v1645_v45 = vmul.f32 %v1643_v4, %v1643_v4 }
0x1179   :  { %v1647_v44 = vsel %vm44_vm0, %v1645_v45, 0.0 }
0x117a   :  { %1648 = vadd.xlane.f32.xlu1 %v1647_v44 }
0x11be   :  { %v1640_v46 = vpop.xlane.xlu0 %1639 }
0x11bf   :  { %v1642_v41 = vmul.f32 %v1640_v46, %v2332_v43 }
0x11c1   :  { %v1644_v48 = vsub.f32 %v1634_v30, %v1642_v41 }
0x11c3   :  { %v1646_v49 = vmul.f32 %v1644_v48, %v1644_v48 }
0x11c5   :  { %v1650_v9 = vsel %vm44_vm0, %v1646_v49, 0.0 }
0x11c6   :  { %1651 = vadd.xlane.f32.xlu2 %v1650_v9 }
0x11ed   :  { %v1649_v19 = vpop.xlane.xlu1 %1648 }
0x11ee   :  { %v1653_v47 = vmul.f32 %v1649_v19, %v2332_v43 }
0x11f0   :  { %v1655_v54 = vadd.f32 1e-05, %v1653_v47 }
0x11f2   :  { %2068 = vrsqrt.f32 %v1655_v54  ;;  %vm1663_vm11 = vweird.f32 %v1655_v54 }
0x11f8   :  { %v2069_v55 = vpop.eup %2068 }
0x11f9   :  { %v1658_v56 = vmul.f32 %v2069_v55, %v1655_v54  ;;  %vm1664_vm1 = vweird.f32 %v2069_v55 }
0x11fa   :  { %vm1665_vm12 = vmor %vm1663_vm11, %vm1664_vm1 }
0x11fb   :  { %v1659_v57 = vmul.f32 %v2069_v55, %v1658_v56 }
0x11fd   :  { %v1660_v58 = vmul.f32 0.5, %v1659_v57 }
0x11ff   :  { %v1661_v59 = vsub.f32 1.5, %v1660_v58 }
0x1201   :  { %v1662_v24 = vmul.f32 %v2069_v55, %v1661_v59 }
0x1203   :  { %v1666_v62 = vsel %vm1665_vm12, %v2069_v55, %v1662_v24 }
0x1204   :  { %v1677_v63 = vmul.f32 %v1666_v62, %v1643_v4 }
0x1206   :  { %v1680_v1 = vmul.f32 %v1679_v60, %v1677_v63 }
0x1208   :  { %v2592_v2 = vadd.f32 %v1682_v0, %v1680_v1 }
0x120a   :  { %1959 = vmatmul.msk.f32.vlgmr.msra.gmra.mxu0 %vm44_vm0, %v2592_v2 }
0x1239   :  { %v1652_v3 = vpop.xlane.xlu2 %1651 }
0x123a   :  { %v1654_v7 = vmul.f32 %v1652_v3, %v2332_v43 }
0x123c   :  { %v1656_v53 = vadd.f32 1e-05, %v1654_v7 }
0x123e   :  { %2070 = vrsqrt.f32 %v1656_v53  ;;  %vm1673_vm14 = vweird.f32 %v1656_v53 }
0x1244   :  { %v2071_v8 = vpop.eup %2070 }
0x1245   :  { %v1668_v10 = vmul.f32 %v2071_v8, %v1656_v53  ;;  %vm1674_vm13 = vweird.f32 %v2071_v8 }
0x1246   :  { %vm1675_vm15 = vmor %vm1673_vm14, %vm1674_vm13 }
0x1247   :  { %v1669_v12 = vmul.f32 %v2071_v8, %v1668_v10 }
0x1249   :  { %v1670_v13 = vmul.f32 0.5, %v1669_v12 }
0x124b   :  { %v1671_v61 = vsub.f32 1.5, %v1670_v13 }
0x124d   :  { %v1672_v15 = vmul.f32 %v2071_v8, %v1671_v61 }
0x124f   :  { %v1676_v11 = vsel %vm1675_vm15, %v2071_v8, %v1672_v15 }
0x1250   :  { %v1678_v16 = vmul.f32 %v1676_v11, %v1644_v48 }
0x1252   :  { %v1681_v34 = vmul.f32 %v1679_v60, %v1678_v16  ;;  %v1769_v60 = vperm.slane %v2434_v50, 3 }
0x1254   :  { %v2597_v5 = vadd.f32 %v1682_v0, %v1681_v34 }
0x1256   :  { %1960 = vmatmul.msk.f32.gmra.mxu0 %vm44_vm0, %v2597_v5 }
0x1287   :  { %v1714_v26 = vpop.f32.mrf.mxu0 }
0x1288   :  { %v1715_v28 = vadd.f32 %v1714_v26, %v1690_v18 }
0x128a   :  { %v1720_v31 = vsub.f32 0.0, %v1715_v28 }
0x128c   :  { %v1722_v32 = vmul.f32 1.442695, %v1720_v31 }
0x128e   :  { %2072 = vpow2.f32 %v1722_v32  ;;  %v1848_v32 = vperm.slane %v2434_v50, 7 }
0x1294   :  { %v2073_v33 = vpop.eup %2072 }
0x1295   :  { %v1726_v35 = vadd.f32 1.0, %v2073_v33 }
0x1297   :  { %2074 = vrcp.f32 %v1726_v35  ;;  %v1739_v30 = vand.u32 2147483648, %v1726_v35  ;;  %v1737_v40 = vand.u32 2147483647, %v1726_v35  ;;  %vm1733_vm3 = vweird.f32 %v1726_v35 }
0x1299   :  { %v1740_v4 = vor.u32 1.1754944e-38, %v1739_v30  ;;  %vm1738_vm5 = vcmp.eq.f32.partialorder %v1737_v40, 8.507059e+37 }
0x129d   :  { %v2075_v36 = vpop.eup %2074 }
0x129e   :  { %v1729_v37 = vmul.f32 %v2075_v36, %v1726_v35  ;;  %vm1734_vm2 = vweird.f32 %v2075_v36 }
0x129f   :  { %vm1735_vm4 = vmor %vm1733_vm3, %vm1734_vm2 }
0x12a0   :  { %v1730_v38 = vsub.f32 1.0, %v1729_v37 }
0x12a2   :  { %v1731_v39 = vmul.f32 %v2075_v36, %v1730_v38 }
0x12a4   :  { %v1732_v42 = vadd.f32 %v2075_v36, %v1731_v39 }
0x12a6   :  { %v1736_v45 = vsel %vm1735_vm4, %v2075_v36, %v1732_v42 }
0x12a7   :  { %v1741_v44 = vsel %vm1738_vm5, %v1740_v4, %v1736_v45 }
0x12a8   :  { %v1758_v46 = vmul.f32 %v1741_v44, %v1715_v28  ;;  %v1845_v28 = vperm.slane %v2434_v50, 6 }
0x12aa   :  { %1969 = vmatmul.msk.f32.vlgmr.msra.gmra.mxu3 %vm865_vm10, %v1758_v46 }
0x12d3   :  { %v1717_v41 = vpop.f32.mrf.mxu0 }
0x12d4   :  { %v1718_v48 = vadd.f32 %v1717_v41, %v1690_v18 }
0x12d6   :  { %v1721_v49 = vsub.f32 0.0, %v1718_v48 }
0x12d8   :  { %v1724_v9 = vmul.f32 1.442695, %v1721_v49 }
0x12da   :  { %2076 = vpow2.f32 %v1724_v9 }
0x12e0   :  { %v2077_v14 = vpop.eup %2076 }
0x12e1   :  { %v1727_v51 = vadd.f32 1.0, %v2077_v14 }
0x12e3   :  { %2078 = vrcp.f32 %v1727_v51  ;;  %v1754_v47 = vand.u32 2147483648, %v1727_v51  ;;  %v1752_v55 = vand.u32 2147483647, %v1727_v51  ;;  %vm1748_vm7 = vweird.f32 %v1727_v51 }
0x12e5   :  { %v1755_v57 = vor.u32 1.1754944e-38, %v1754_v47  ;;  %vm1753_vm9 = vcmp.eq.f32.partialorder %v1752_v55, 8.507059e+37 }
0x12e9   :  { %v2079_v52 = vpop.eup %2078 }
0x12ea   :  { %v1744_v6 = vmul.f32 %v2079_v52, %v1727_v51  ;;  %vm1749_vm6 = vweird.f32 %v2079_v52 }
0x12eb   :  { %vm1750_vm8 = vmor %vm1748_vm7, %vm1749_vm6 }
0x12ec   :  { %v1745_v19 = vsub.f32 1.0, %v1744_v6 }
0x12ee   :  { %v1746_v54 = vmul.f32 %v2079_v52, %v1745_v19 }
0x12f0   :  { %v1747_v56 = vadd.f32 %v2079_v52, %v1746_v54 }
0x12f2   :  { %v1751_v58 = vsel %vm1750_vm8, %v2079_v52, %v1747_v56 }
0x12f3   :  { %v1756_v59 = vsel %vm1753_vm9, %v1755_v57, %v1751_v58 }
0x12f4   :  { %v1759_v24 = vmul.f32 %v1756_v59, %v1718_v48 }
0x12f6   :  { %1970 = vmatmul.msk.f32.gmra.mxu3 %vm865_vm10, %v1759_v24 }
0x132d   :  { %v1793_v62 = vpop.f32.mrf.mxu3 }
0x132e   :  { %v1794_v63 = vadd.f32 %v1793_v62, %v1769_v60 }
0x1330   :  { %v1799_v0 = vadd.f32 %v1794_v63, %v2592_v2 }
0x1332   :  { %v1801_v1 = vsel %vm44_vm0, %v1799_v0, 0.0 }
0x1333   :  { %1802 = vadd.xlane.f32.xlu0 %v1801_v1 }
0x1379   :  { %v1796_v3 = vpop.f32.mrf.mxu3 }
0x137a   :  { %v1797_v7 = vadd.f32 %v1796_v3, %v1769_v60 }
0x137c   :  { %v1800_v53 = vadd.f32 %v1797_v7, %v2597_v5 }
0x137e   :  { %v1804_v8 = vsel %vm44_vm0, %v1800_v53, 0.0 }
0x137f   :  { %1805 = vadd.xlane.f32.xlu2 %v1804_v8 }
0x13a6   :  { %v1803_v10 = vpop.xlane.xlu0 %1802 }
0x13a7   :  { %v1807_v12 = vmul.f32 %v1803_v10, %v2332_v43 }
0x13a9   :  { %v1809_v13 = vsub.f32 %v1799_v0, %v1807_v12 }
0x13ab   :  { %v1811_v61 = vmul.f32 %v1809_v13, %v1809_v13 }
0x13ad   :  { %v1813_v15 = vsel %vm44_vm0, %v1811_v61, 0.0 }
0x13ae   :  { %1814 = vadd.xlane.f32.xlu0 %v1813_v15 }
0x13f2   :  { %v1806_v11 = vpop.xlane.xlu2 %1805 }
0x13f3   :  { %v1808_v2 = vmul.f32 %v1806_v11, %v2332_v43 }
0x13f5   :  { %v1810_v16 = vsub.f32 %v1800_v53, %v1808_v2 }
0x13f7   :  { %v1812_v34 = vmul.f32 %v1810_v16, %v1810_v16 }
0x13f9   :  { %v1816_v17 = vsel %vm44_vm0, %v1812_v34, 0.0 }
0x13fa   :  { %1817 = vadd.xlane.f32.xlu1 %v1816_v17 }
0x1421   :  { %v1815_v5 = vpop.xlane.xlu0 %1814 }
0x1422   :  { %v1819_v20 = vmul.f32 %v1815_v5, %v2332_v43 }
0x1424   :  { %v1821_v21 = vadd.f32 1e-05, %v1819_v20 }
0x1426   :  { %2080 = vrsqrt.f32 %v1821_v21  ;;  %vm1829_vm1 = vweird.f32 %v1821_v21 }
0x142c   :  { %v2081_v22 = vpop.eup %2080 }
0x142d   :  { %v1824_v23 = vmul.f32 %v2081_v22, %v1821_v21  ;;  %vm1830_vm10 = vweird.f32 %v2081_v22 }
0x142e   :  { %vm1831_vm11 = vmor %vm1829_vm1, %vm1830_vm10 }
0x142f   :  { %v1825_v18 = vmul.f32 %v2081_v22, %v1824_v23 }
0x1431   :  { %v1826_v25 = vmul.f32 0.5, %v1825_v18 }
0x1433   :  { %v1827_v26 = vsub.f32 1.5, %v1826_v25 }
0x1435   :  { %v1828_v27 = vmul.f32 %v2081_v22, %v1827_v26 }
0x1437   :  { %v1832_v29 = vsel %vm1831_vm11, %v2081_v22, %v1828_v27 }
0x1438   :  { %v1843_v31 = vmul.f32 %v1832_v29, %v1809_v13 }
0x143a   :  { %v1846_v33 = vmul.f32 %v1845_v28, %v1843_v31 }
0x143c   :  { %v1849_v35 = vadd.f32 %v1848_v32, %v1846_v33 }
0x143e   :  { %1851 = vst.msk [vmem:[#allocation2] sm:$0xff] %vm44_vm0, %v1849_v35 }
0x146d   :  { %v1818_v36 = vpop.xlane.xlu1 %1817 }
0x146e   :  { %v1820_v37 = vmul.f32 %v1818_v36, %v2332_v43 }
0x1470   :  { %v1822_v38 = vadd.f32 1e-05, %v1820_v37 }
0x1472   :  { %2082 = vrsqrt.f32 %v1822_v38  ;;  %vm1839_vm13 = vweird.f32 %v1822_v38 }
0x1478   :  { %v2083_v30 = vpop.eup %2082 }
0x1479   :  { %v1834_v39 = vmul.f32 %v2083_v30, %v1822_v38  ;;  %vm1840_vm12 = vweird.f32 %v2083_v30 }
0x147a   :  { %vm1841_vm14 = vmor %vm1839_vm13, %vm1840_vm12 }
0x147b   :  { %v1835_v40 = vmul.f32 %v2083_v30, %v1834_v39 }
0x147d   :  { %v1836_v42 = vmul.f32 0.5, %v1835_v40 }
0x147f   :  { %v1837_v4 = vsub.f32 1.5, %v1836_v42 }
0x1481   :  { %v1838_v45 = vmul.f32 %v2083_v30, %v1837_v4 }
0x1483   :  { %v1842_v44 = vsel %vm1841_vm14, %v2083_v30, %v1838_v45 }
0x1484   :  { %v1844_v50 = vmul.f32 %v1842_v44, %v1810_v16 }
0x1486   :  { %v1847_v43 = vmul.f32 %v1845_v28, %v1844_v50 }
0x1488   :  { %v1850_v46 = vadd.f32 %v1848_v32, %v1847_v43 }
0x148a   :  { %1852 = vst.msk [vmem:[#allocation2 + $0x8] sm:$0xff] %vm44_vm0, %v1850_v46 }
0x148b   :  { %1865 = dma.vmem_to_hbm [thread:$0]  %s1858_s0, 256, %s1860_s20, [#allocation3], %s2123_s21, %s2123_s21, %s2124_s3  }
0x148c   :  { %2108 = dma.done.wait [#allocation3], 256  }
0x148d   :  { %2109 = vsyncadd [#allocation3], 4294967040 }
0x148e   :  { %1870 = vsyncpa [#allocation3], 1 }

</bundles_post_ra>
